<compile_context>
chip_gen: v7x
topology: tpu7x:2x2x1
jax: 0.10.0
libtpu: 0.0.40
codegen_flags: <defaults>
</compile_context>

<pallas_src>
import functools

import jax
import jax.numpy as jnp
from jax.experimental import pallas as pl
from jax.experimental.pallas import tpu as pltpu

EPS = 1e-5                    # nn.BatchNorm2d default eps
LANE = 128                    # TPU lane width
MXU_DTYPE = jnp.float32       # set to jnp.bfloat16 on v6e/v7x for ~3-4x MXU


def _round_up(x, m):
    return (x + m - 1) // m * m


def _vmem_limit_bytes():
    try:
        cap = getattr(pltpu.get_tpu_info(), "vmem_capacity_bytes", None)
        if not cap:
            cap = 128 << 20
    except Exception:
        cap = 128 << 20
    # half of physical, clamped to [32 MiB, 100 MiB]  (v7x -> 32, v5e/v6e -> 64)
    return int(max(32 << 20, min(cap // 2, 100 << 20)))


def _cparams():
    return pltpu.CompilerParams(dimension_semantics=("parallel",),
                                vmem_limit_bytes=_vmem_limit_bytes())


# ---------------------------------------------------------------------------
# In-kernel helpers
# ---------------------------------------------------------------------------
def _write_stats8(st_ref, acc):
    """Partial BN stats as a full (8, C) block: even rows = sum, odd = sum-sq."""
    s = jnp.sum(acc, axis=0, keepdims=True)
    sq = jnp.sum(acc * acc, axis=0, keepdims=True)
    row = jax.lax.broadcasted_iota(jnp.int32, (8, acc.shape[-1]), 0)
    st_ref[0] = jnp.where(row % 2 == 0, s, sq)


def _conv3x3_taps(xv, w_ref, ho, wo):
    """3x3 stride-1 conv of a zero-padded VMEM tile as 9 shifted MXU matmuls.

    xv:    (ho+2, wo+2, K) f32 value (spatially zero-padded)
    w_ref: (9, K, Cout) weight ref (MXU dtype), tap k = kh*3 + kw
    returns f32 (ho*wo, Cout)
    """
    k = xv.shape[-1]
    acc = None
    for kh in range(3):
        for kw in range(3):
            win = xv[kh:kh + ho, kw:kw + wo, :].reshape(ho * wo, k)
            part = jnp.dot(win.astype(w_ref.dtype), w_ref[kh * 3 + kw],
                           preferred_element_type=jnp.float32)
            acc = part if acc is None else acc + part
    return acc


# ---------------------------------------------------------------------------
# Pallas kernels
# ---------------------------------------------------------------------------
def _conv1_s1_kernel(x_ref, w_ref, z_ref, st_ref, xbuf, *, h, w, cin):
    """conv1 (3x3, stride 1): in-kernel zero-padding + 9-tap conv + BN1 stats."""
    xbuf[...] = jnp.zeros_like(xbuf)                 # zero halo + channel pad
    xbuf[1:1 + h, 1:1 + w, 0:cin] = x_ref[0]
    acc = _conv3x3_taps(xbuf[...], w_ref, h, w)
    z_ref[0] = acc.reshape(h, w, acc.shape[-1])
    _write_stats8(st_ref, acc)


def _conv1_s2_kernel(x2_ref, wm_ref, z_ref, st_ref, s4, *, ho, wo, c2):
    """conv1 (3x3, stride 2) as a phase-decomposed direct conv.

    x2_ref: (1, 2*ho, wo, 2*Cin) - input with column pairs packed into channels
    wm_ref: (6, Kpad, Cout)      - merged taps, t = kh*2 + m
    s4:     (ho+1, 2, wo+2, Kpad) VMEM scratch (row pairs x row phase)
    """
    s4[...] = jnp.zeros_like(s4)
    s4[1:1 + ho, :, 1:1 + wo, 0:c2] = x2_ref[0].reshape(ho, 2, wo, c2)
    sv = s4[...]
    k = sv.shape[-1]
    acc = None
    # (row_start, row_phase) per kh; column windows m: 0 -> [0:wo], 1 -> [1:1+wo]
    for kh, (rs, ph) in enumerate(((0, 1), (1, 0), (1, 1))):
        for m in range(2):
            win = sv[rs:rs + ho, ph, m:m + wo, :].reshape(ho * wo, k)
            part = jnp.dot(win.astype(wm_ref.dtype), wm_ref[kh * 2 + m],
                           preferred_element_type=jnp.float32)
            acc = part if acc is None else acc + part
    z_ref[0] = acc.reshape(ho, wo, acc.shape[-1])
    _write_stats8(st_ref, acc)


def _conv2_body(z1_ref, sc_ref, sh_ref, w2_ref, xsc_ref, wr_ref,
                z2_ref, st_ref, ybuf, xsbuf, *, ho, wo, cin, stride):
    """Fused BN1+ReLU -> conv2 (3x3, stride 1) -> +shortcut -> BN2 stats."""
    cop = z1_ref.shape[-1]
    # BN1 normalize + ReLU straight into a 1-px zero-padded VMEM tile.
    ybuf[...] = jnp.zeros_like(ybuf)
    sc = sc_ref[...].reshape(1, 1, cop)
    sh = sh_ref[...].reshape(1, 1, cop)
    ybuf[1:1 + ho, 1:1 + wo, :] = jnp.maximum(z1_ref[0] * sc + sh, 0.0)
    acc = _conv3x3_taps(ybuf[...], w2_ref, ho, wo)
    # Shortcut directly from the (reshaped) input block - no HBM copy.
    if stride == 1:
        xs = xsc_ref[0]                                        # (ho, wo, cin)
    else:  # stride 2: even rows + phase-0 (even) columns of the packed view
        xs = xsc_ref[0].reshape(ho, 2, wo, 2 * cin)[:, 0, :, 0:cin]
    xsbuf[...] = jnp.zeros_like(xsbuf)
    xsbuf[:, 0:cin] = xs.reshape(ho * wo, cin)
    if wr_ref is not None:                                     # projection 1x1
        acc = acc + jnp.dot(xsbuf[...].astype(wr_ref.dtype), wr_ref[...],
                            preferred_element_type=jnp.float32)
    else:                                                      # identity add
        acc = acc + xsbuf[...]
    z2_ref[0] = acc.reshape(ho, wo, cop)
    _write_stats8(st_ref, acc)


def _conv2_proj_kernel(z1, sc, sh, w2, xsc, wr, z2, st, ybuf, xsbuf, **kw):
    _conv2_body(z1, sc, sh, w2, xsc, wr, z2, st, ybuf, xsbuf, **kw)


def _conv2_id_kernel(z1, sc, sh, w2, xsc, z2, st, ybuf, xsbuf, **kw):
    _conv2_body(z1, sc, sh, w2, xsc, None, z2, st, ybuf, xsbuf, **kw)


def _bn_relu_kernel(z_ref, sc_ref, sh_ref, o_ref):
    """Final pass: y = max(z*scale + shift, 0) (BN2 needs global stats)."""
    sc = sc_ref[...].reshape(1, 1, -1)
    sh = sh_ref[...].reshape(1, 1, -1)
    o_ref[0] = jnp.maximum(z_ref[0] * sc + sh, 0.0)


# ---------------------------------------------------------------------------
# pallas_call wrappers
# ---------------------------------------------------------------------------
def _call_conv1_s1(x, w1, cipad, cop):
    n, h, w, cin = x.shape
    kern = functools.partial(_conv1_s1_kernel, h=h, w=w, cin=cin)
    flops = 2 * n * h * w * 9 * cipad * cop
    bytes_acc = int(x.size * 4 + w1.size * w1.dtype.itemsize
                    + n * h * w * cop * 4 + n * 8 * cop * 4)
    return pl.pallas_call(
        kern,
        out_shape=(jax.ShapeDtypeStruct((n, h, w, cop), jnp.float32),
                   jax.ShapeDtypeStruct((n, 8, cop), jnp.float32)),
        grid=(n,),
        in_specs=[pl.BlockSpec((1, h, w, cin), lambda i: (i, 0, 0, 0)),
                  pl.BlockSpec((9, cipad, cop), lambda i: (0, 0, 0))],
        out_specs=(pl.BlockSpec((1, h, w, cop), lambda i: (i, 0, 0, 0)),
                   pl.BlockSpec((1, 8, cop), lambda i: (i, 0, 0))),
        scratch_shapes=[pltpu.VMEM((h + 2, w + 2, cipad), jnp.float32)],
        compiler_params=_cparams(),
        cost_estimate=pl.CostEstimate(flops=int(flops), transcendentals=0,
                                      bytes_accessed=bytes_acc),
    )(x, w1)


def _call_conv1_s2(x2, wm, ho, wo, c2pad, cop):
    n, h, w2, c2 = x2.shape
    kern = functools.partial(_conv1_s2_kernel, ho=ho, wo=wo, c2=c2)
    flops = 2 * n * ho * wo * 6 * c2pad * cop
    bytes_acc = int(x2.size * 4 + wm.size * wm.dtype.itemsize
                    + n * ho * wo * cop * 4 + n * 8 * cop * 4)
    return pl.pallas_call(
        kern,
        out_shape=(jax.ShapeDtypeStruct((n, ho, wo, cop), jnp.float32),
                   jax.ShapeDtypeStruct((n, 8, cop), jnp.float32)),
        grid=(n,),
        in_specs=[pl.BlockSpec((1, h, w2, c2), lambda i: (i, 0, 0, 0)),
                  pl.BlockSpec((6, c2pad, cop), lambda i: (0, 0, 0))],
        out_specs=(pl.BlockSpec((1, ho, wo, cop), lambda i: (i, 0, 0, 0)),
                   pl.BlockSpec((1, 8, cop), lambda i: (i, 0, 0))),
        scratch_shapes=[pltpu.VMEM((ho + 1, 2, wo + 2, c2pad), jnp.float32)],
        compiler_params=_cparams(),
        cost_estimate=pl.CostEstimate(flops=int(flops), transcendentals=0,
                                      bytes_accessed=bytes_acc),
    )(x2, wm)


def _call_conv2(z1, sc1, sh1, w2, xsc, wr, ho, wo, cin, stride, cop, xsb_c):
    n = z1.shape[0]
    _, hx, wx, cx = xsc.shape
    if wr is not None:
        kern = functools.partial(_conv2_proj_kernel, ho=ho, wo=wo,
                                 cin=cin, stride=stride)
        extra_in = [wr]
        extra_specs = [pl.BlockSpec(wr.shape, lambda i: (0, 0))]
        proj_flops = 2 * n * ho * wo * xsb_c * cop
        wr_bytes = wr.size * wr.dtype.itemsize
    else:
        kern = functools.partial(_conv2_id_kernel, ho=ho, wo=wo,
                                 cin=cin, stride=stride)
        extra_in = []
        extra_specs = []
        proj_flops = 0
        wr_bytes = 0
    flops = 2 * n * ho * wo * 9 * cop * cop + proj_flops
    bytes_acc = int(z1.size * 4 + w2.size * w2.dtype.itemsize + xsc.size * 4
                    + wr_bytes + 2 * cop * 4 + n * ho * wo * cop * 4
                    + n * 8 * cop * 4)
    return pl.pallas_call(
        kern,
        out_shape=(jax.ShapeDtypeStruct((n, ho, wo, cop), jnp.float32),
                   jax.ShapeDtypeStruct((n, 8, cop), jnp.float32)),
        grid=(n,),
        in_specs=[pl.BlockSpec((1, ho, wo, cop), lambda i: (i, 0, 0, 0)),
                  pl.BlockSpec((1, cop), lambda i: (0, 0)),
                  pl.BlockSpec((1, cop), lambda i: (0, 0)),
                  pl.BlockSpec((9, cop, cop), lambda i: (0, 0, 0)),
                  pl.BlockSpec((1, hx, wx, cx), lambda i: (i, 0, 0, 0))]
                 + extra_specs,
        out_specs=(pl.BlockSpec((1, ho, wo, cop), lambda i: (i, 0, 0, 0)),
                   pl.BlockSpec((1, 8, cop), lambda i: (i, 0, 0))),
        scratch_shapes=[pltpu.VMEM((ho + 2, wo + 2, cop), jnp.float32),
                        pltpu.VMEM((ho * wo, xsb_c), jnp.float32)],
        compiler_params=_cparams(),
        cost_estimate=pl.CostEstimate(flops=int(flops), transcendentals=0,
                                      bytes_accessed=bytes_acc),
    )(z1, sc1, sh1, w2, xsc, *extra_in)


def _call_bn_relu(z, scale, shift):
    n, ho, wo, cop = z.shape
    return pl.pallas_call(
        _bn_relu_kernel,
        out_shape=jax.ShapeDtypeStruct(z.shape, jnp.float32),
        grid=(n,),
        in_specs=[pl.BlockSpec((1, ho, wo, cop), lambda i: (i, 0, 0, 0)),
                  pl.BlockSpec((1, cop), lambda i: (0, 0)),
                  pl.BlockSpec((1, cop), lambda i: (0, 0))],
        out_specs=pl.BlockSpec((1, ho, wo, cop), lambda i: (i, 0, 0, 0)),
        compiler_params=_cparams(),
        cost_estimate=pl.CostEstimate(flops=int(2 * z.size), transcendentals=0,
                                      bytes_accessed=int(2 * z.size * 4)),
    )(z, scale, shift)


# ---------------------------------------------------------------------------
# Plain-JAX glue (weight layout / O(C) scalar work only)
# ---------------------------------------------------------------------------
def _prep_w3(w_oihw, kpad, cop, dtype):
    """(Cout, Cin, 3, 3) -> zero-padded (9, kpad, cop), tap k = kh*3 + kw."""
    cout, cin = w_oihw.shape[0], w_oihw.shape[1]
    w = jnp.transpose(w_oihw, (2, 3, 1, 0)).astype(jnp.float32)    # (3,3,cin,cout)
    w = jnp.pad(w, ((0, 0), (0, 0), (0, kpad - cin), (0, cop - cout)))
    return w.reshape(9, kpad, cop).astype(dtype)


def _prep_w3_stride2(w_oihw, kpad, cop, dtype):
    """Stride-2 conv1 weights for the column-pair-packed input view.

    Input is viewed as (N, H, W//2, 2*Cin).  Merged tap t = kh*2 + m:
      m=0 -> window cols [0:wo]:   phase-1 channels carry original kw=0
      m=1 -> window cols [1:1+wo]: phase-0 -> kw=1, phase-1 -> kw=2
    """
    cout, cin = w_oihw.shape[0], w_oihw.shape[1]
    wt = jnp.transpose(w_oihw, (2, 3, 1, 0)).astype(jnp.float32)   # (3,3,cin,cout)
    wm = jnp.zeros((3, 2, kpad, cop), jnp.float32)
    wm = wm.at[:, 0, cin:2 * cin, :cout].set(wt[:, 0])
    wm = wm.at[:, 1, 0:cin, :cout].set(wt[:, 1])
    wm = wm.at[:, 1, cin:2 * cin, :cout].set(wt[:, 2])
    return wm.reshape(6, kpad, cop).astype(dtype)


def _prep_w1(w_oihw, kpad, cop, dtype):
    """1x1 conv weight (Cout, Cin, 1, 1) -> zero-padded (kpad, cop)."""
    cout, cin = w_oihw.shape[0], w_oihw.shape[1]
    w = w_oihw.reshape(cout, cin).T.astype(jnp.float32)
    w = jnp.pad(w, ((0, kpad - cin), (0, cop - cout)))
    return w.astype(dtype)


def _bn_scale_shift(stats, gamma, beta, count, cop):
    """Combine per-tile partial sums into BN scale/shift (O(C) work)."""
    tot = jnp.sum(stats, axis=0)                    # (8, cop); rows 0/1 used
    mean = tot[0] / count
    var = jnp.maximum(tot[1] / count - mean * mean, 0.0)
    g = jnp.pad(gamma.astype(jnp.float32), (0, cop - gamma.shape[0]))
    b = jnp.pad(beta.astype(jnp.float32), (0, cop - beta.shape[0]))
    scale = g * jax.lax.rsqrt(var + EPS)
    shift = b - mean * scale
    return scale.reshape(1, cop), shift.reshape(1, cop)


def residual_block_forward_nhwc(x_nhwc, params, stride, mxu_dtype=MXU_DTYPE):
    # Conv biases are not applied: a per-channel constant before training-mode
    # BatchNorm is exactly cancelled by the mean subtraction.
    x = x_nhwc.astype(jnp.float32)
    n, h, w, cin = x.shape
    cout = params["w1"].shape[0]
    proj = params["wres"] is not None
    assert stride in (1, 2), "ResNet-18 blocks use stride 1 or 2"
    assert proj or stride == 1
    if stride == 2:
        assert h % 2 == 0 and w % 2 == 0   # TODO(synk): odd spatial dims + stride 2
    ho = (h + 2 - 3) // stride + 1
    wo = (w + 2 - 3) // stride + 1
    cop = _round_up(cout, LANE)
    count = n * ho * wo

    # ---- pass 1: direct conv1 (in-kernel zero padding) + partial BN1 stats ----
    if stride == 1:
        cipad = _round_up(cin, LANE)
        w1 = _prep_w3(params["w1"], cipad, cop, mxu_dtype)
        z1, st1 = _call_conv1_s1(x, w1, cipad, cop)
        xsc = x                                         # shortcut source block
    else:
        c2 = 2 * cin
        c2pad = _round_up(c2, LANE)
        w1m = _prep_w3_stride2(params["w1"], c2pad, cop, mxu_dtype)
        xsc = x.reshape(n, h, w // 2, c2)               # free column-pair packing
        z1, st1 = _call_conv1_s2(xsc, w1m, ho, wo, c2pad, cop)

    scale1, shift1 = _bn_scale_shift(st1, params["g1"], params["beta1"],
                                     count, cop)

    # ---- pass 2: fused BN1+ReLU -> conv2 -> +shortcut, partial BN2 stats ----
    w2 = _prep_w3(params["w2"], cop, cop, mxu_dtype)
    if proj:
        cipad = _round_up(cin, LANE)
        wr = _prep_w1(params["wres"], cipad, cop, mxu_dtype)
        xsb_c = cipad
    else:
        wr = None
        xsb_c = cop
    z2, st2 = _call_conv2(z1, scale1, shift1, w2, xsc, wr,
                          ho, wo, cin, stride, cop, xsb_c)

    scale2, shift2 = _bn_scale_shift(st2, params["g2"], params["beta2"],
                                     count, cop)

    # ---- pass 3: BN2 normalize + ReLU (needs global stats) ----
    y = _call_bn_relu(z2, scale2, shift2)
    return y[..., :cout]


def residual_block_forward(x_nchw, params, stride, mxu_dtype=MXU_DTYPE):
    x = jnp.transpose(x_nchw, (0, 2, 3, 1))             # NCHW -> NHWC
    y = residual_block_forward_nhwc(x, params, stride, mxu_dtype)
    return jnp.transpose(y, (0, 3, 1, 2))               # back to NCHW


# ---------------------------------------------------------------------------
# Deterministic parameter init (shapes match the PyTorch module's __init__)
# ---------------------------------------------------------------------------
def init_params(key, num_in, num_out, stride):
    ks = jax.random.split(key, 6)
    s1 = 1.0 / jnp.sqrt(num_in * 9.0)
    s2 = 1.0 / jnp.sqrt(num_out * 9.0)
    params = {
        "w1": jax.random.uniform(ks[0], (num_out, num_in, 3, 3), jnp.float32, -s1, s1),
        "b1": jax.random.uniform(ks[1], (num_out,), jnp.float32, -s1, s1),
        "w2": jax.random.uniform(ks[2], (num_out, num_out, 3, 3), jnp.float32, -s2, s2),
        "b2": jax.random.uniform(ks[3], (num_out,), jnp.float32, -s2, s2),
        "g1": jnp.ones((num_out,), jnp.float32),
        "beta1": jnp.zeros((num_out,), jnp.float32),
        "g2": jnp.ones((num_out,), jnp.float32),
        "beta2": jnp.zeros((num_out,), jnp.float32),
    }
    if num_in != num_out or stride != 1:
        sr = 1.0 / jnp.sqrt(float(num_in))
        params["wres"] = jax.random.uniform(ks[4], (num_out, num_in, 1, 1),
                                            jnp.float32, -sr, sr)
        params["bres"] = jax.random.uniform(ks[5], (num_out,), jnp.float32, -sr, sr)
    else:
        params["wres"] = None
        params["bres"] = None
    return params


# ---------------------------------------------------------------------------
# Pure-JAX reference (mirrors the PyTorch forward, biases included)
# ---------------------------------------------------------------------------
def reference_forward(x_nchw, params, stride):
    def conv(x, w, b, s, pad):
        y = jax.lax.conv_general_dilated(
            x, w, (s, s), [(pad, pad), (pad, pad)],
            dimension_numbers=("NCHW", "OIHW", "NCHW"))
        return y + b[None, :, None, None]

    def bn(x, g, bta):
        m = jnp.mean(x, axis=(0, 2, 3), keepdims=True)
        v = jnp.mean((x - m) ** 2, axis=(0, 2, 3), keepdims=True)
        return (x - m) * jax.lax.rsqrt(v + EPS) * g[None, :, None, None] \
            + bta[None, :, None, None]

    out = conv(x_nchw, params["w1"], params["b1"], stride, 1)
    out = jnp.maximum(bn(out, params["g1"], params["beta1"]), 0.0)
    out = conv(out, params["w2"], params["b2"], 1, 1)
    if params["wres"] is not None:
        res = conv(x_nchw, params["wres"], params["bres"], stride, 0)
    else:
        res = x_nchw
    out = out + res
    out = jnp.maximum(bn(out, params["g2"], params["beta2"]), 0.0)
    return out


if __name__ == "__main__":
    key = jax.random.PRNGKey(0)
    configs = [
        # (N, C_in, C_out, H, W, stride)
        (2, 4, 8, 16, 16, 1),    # projection shortcut, stride 1
        (2, 4, 8, 16, 16, 2),    # strided projection (in-kernel phase-decomposed conv)
        (2, 8, 8, 16, 16, 1),    # identity shortcut (plain VPU add)
    ]
    for idx, (n, ci, co, h, w, s) in enumerate(configs):
        key, kx, kp = jax.random.split(key, 3)
        x = jax.random.normal(kx, (n, ci, h, w), jnp.float32)
        params = init_params(kp, ci, co, s)

        out = jax.block_until_ready(residual_block_forward(x, params, s))
        ref = reference_forward(x, params, s)

        ho = (h - 1) // s + 1
        wo = (w - 1) // s + 1
        assert out.shape == ref.shape == (n, co, ho, wo), f"config {idx}: bad shape"
        err = float(jnp.max(jnp.abs(out - ref)))
        assert err < 1e-3, f"config {idx}: f32 max abs err too large: {err}"

    # bf16 MXU-operand fast path (v6e/v7x); loose tolerance for bf16 rounding.
    n, ci, co, h, w, s = configs[2]
    key, kx, kp = jax.random.split(key, 3)
    x = jax.random.normal(kx, (n, ci, h, w), jnp.float32)
    params = init_params(kp, ci, co, s)
    out = jax.block_until_ready(
        residual_block_forward(x, params, s, mxu_dtype=jnp.bfloat16))
    ref = reference_forward(x, params, s)
    err = float(jnp.max(jnp.abs(out - ref)))
    assert err < 1e-1, f"bf16 max abs err too large: {err}"

    print("KERNEL_OK")
</pallas_src>

<mosaic_0001>
module attributes {stable_mosaic.version = 11 : i64} {
  func.func @_conv1_s1_kernel(%arg0: i32, %arg1: memref<1x16x16x4xf32, #tpu.memory_space<vmem>>, %arg2: memref<9x128x128xf32, #tpu.memory_space<vmem>>, %arg3: memref<1x16x16x128xf32, #tpu.memory_space<vmem>>, %arg4: memref<1x8x128xf32, #tpu.memory_space<vmem>>, %arg5: memref<18x18x128xf32, #tpu.memory_space<vmem>>) attributes {dimension_semantics = [#tpu.dimension_semantics<parallel>], iteration_bounds = array<i64: 2>, scalar_prefetch = 0 : i64, scratch_operands = 1 : i64, tpu.core_type = #tpu.core_type<tc>, window_params = [{transform_indices = @transform_0, window_bounds = array<i64: 1, 16, 16, 4>}, {pipeline_mode = #tpu.pipeline_mode<synchronous>, transform_indices = @transform_1, window_bounds = array<i64: 9, 128, 128>}, {transform_indices = @transform_2, window_bounds = array<i64: 1, 16, 16, 128>}, {transform_indices = @transform_3, window_bounds = array<i64: 1, 8, 128>}]} {
    %cst = arith.constant 0.000000e+00 : f32
    %0 = vector.broadcast %cst : f32 to vector<18x18x128xf32>
    %c0 = arith.constant 0 : index
    %c0_0 = arith.constant 0 : index
    %c0_1 = arith.constant 0 : index
    %1 = vector.load %arg5[%c0, %c0_0, %c0_1] : memref<18x18x128xf32, #tpu.memory_space<vmem>>, vector<18x18x128xf32>
    tpu.vector_store %arg5[%c0, %c0_0, %c0_1], %0 {strides = array<i32>} : memref<18x18x128xf32, #tpu.memory_space<vmem>>, vector<18x18x128xf32>,
    %c0_2 = arith.constant 0 : index
    %c0_3 = arith.constant 0 : index
    %c0_4 = arith.constant 0 : index
    %c0_5 = arith.constant 0 : index
    %2 = vector.load %arg1[%c0_2, %c0_3, %c0_4, %c0_5] : memref<1x16x16x4xf32, #tpu.memory_space<vmem>>, vector<1x16x16x4xf32>
    %3 = vector.shape_cast %2 : vector<1x16x16x4xf32> to vector<16x16x4xf32>
    %c1 = arith.constant 1 : index
    %c1_6 = arith.constant 1 : index
    %c0_7 = arith.constant 0 : index
    %4 = vector.load %arg5[%c1, %c1_6, %c0_7] : memref<18x18x128xf32, #tpu.memory_space<vmem>>, vector<16x16x4xf32>
    tpu.vector_store %arg5[%c1, %c1_6, %c0_7], %3 {strides = array<i32>} : memref<18x18x128xf32, #tpu.memory_space<vmem>>, vector<16x16x4xf32>,
    %c0_8 = arith.constant 0 : index
    %c0_9 = arith.constant 0 : index
    %c0_10 = arith.constant 0 : index
    %5 = vector.load %arg5[%c0_8, %c0_9, %c0_10] : memref<18x18x128xf32, #tpu.memory_space<vmem>>, vector<18x18x128xf32>
    %6 = vector.extract_strided_slice %5 {offsets = [0, 0, 0], sizes = [16, 16, 128], strides = [1, 1, 1]} : vector<18x18x128xf32> to vector<16x16x128xf32>
    %7 = vector.shape_cast %6 : vector<16x16x128xf32> to vector<256x128xf32>
    %c0_11 = arith.constant 0 : index
    %c0_12 = arith.constant 0 : index
    %c0_13 = arith.constant 0 : index
    %8 = vector.load %arg2[%c0_11, %c0_12, %c0_13] : memref<9x128x128xf32, #tpu.memory_space<vmem>>, vector<1x128x128xf32>
    %9 = vector.shape_cast %8 : vector<1x128x128xf32> to vector<128x128xf32>
    %cst_14 = arith.constant dense<0.000000e+00> : vector<256x128xf32>
    %10 = tpu.matmul %7, %9, %cst_14 {dimension_numbers = #tpu.dot_dimension_numbers<[1], [0], [0], [1], [0, 0, 1, 1], [], []>} : vector<256x128xf32>, vector<128x128xf32>, vector<256x128xf32> -> vector<256x128xf32>
    %11 = vector.extract_strided_slice %5 {offsets = [0, 1, 0], sizes = [16, 16, 128], strides = [1, 1, 1]} : vector<18x18x128xf32> to vector<16x16x128xf32>
    %12 = vector.shape_cast %11 : vector<16x16x128xf32> to vector<256x128xf32>
    %c1_15 = arith.constant 1 : index
    %c0_16 = arith.constant 0 : index
    %c0_17 = arith.constant 0 : index
    %13 = vector.load %arg2[%c1_15, %c0_16, %c0_17] : memref<9x128x128xf32, #tpu.memory_space<vmem>>, vector<1x128x128xf32>
    %14 = vector.shape_cast %13 : vector<1x128x128xf32> to vector<128x128xf32>
    %cst_18 = arith.constant dense<0.000000e+00> : vector<256x128xf32>
    %15 = tpu.matmul %12, %14, %cst_18 {dimension_numbers = #tpu.dot_dimension_numbers<[1], [0], [0], [1], [0, 0, 1, 1], [], []>} : vector<256x128xf32>, vector<128x128xf32>, vector<256x128xf32> -> vector<256x128xf32>
    %16 = arith.addf %10, %15 : vector<256x128xf32>
    %17 = vector.extract_strided_slice %5 {offsets = [0, 2, 0], sizes = [16, 16, 128], strides = [1, 1, 1]} : vector<18x18x128xf32> to vector<16x16x128xf32>
    %18 = vector.shape_cast %17 : vector<16x16x128xf32> to vector<256x128xf32>
    %c2 = arith.constant 2 : index
    %c0_19 = arith.constant 0 : index
    %c0_20 = arith.constant 0 : index
    %19 = vector.load %arg2[%c2, %c0_19, %c0_20] : memref<9x128x128xf32, #tpu.memory_space<vmem>>, vector<1x128x128xf32>
    %20 = vector.shape_cast %19 : vector<1x128x128xf32> to vector<128x128xf32>
    %cst_21 = arith.constant dense<0.000000e+00> : vector<256x128xf32>
    %21 = tpu.matmul %18, %20, %cst_21 {dimension_numbers = #tpu.dot_dimension_numbers<[1], [0], [0], [1], [0, 0, 1, 1], [], []>} : vector<256x128xf32>, vector<128x128xf32>, vector<256x128xf32> -> vector<256x128xf32>
    %22 = arith.addf %16, %21 : vector<256x128xf32>
    %23 = vector.extract_strided_slice %5 {offsets = [1, 0, 0], sizes = [16, 16, 128], strides = [1, 1, 1]} : vector<18x18x128xf32> to vector<16x16x128xf32>
    %24 = vector.shape_cast %23 : vector<16x16x128xf32> to vector<256x128xf32>
    %c3 = arith.constant 3 : index
    %c0_22 = arith.constant 0 : index
    %c0_23 = arith.constant 0 : index
    %25 = vector.load %arg2[%c3, %c0_22, %c0_23] : memref<9x128x128xf32, #tpu.memory_space<vmem>>, vector<1x128x128xf32>
    %26 = vector.shape_cast %25 : vector<1x128x128xf32> to vector<128x128xf32>
    %cst_24 = arith.constant dense<0.000000e+00> : vector<256x128xf32>
    %27 = tpu.matmul %24, %26, %cst_24 {dimension_numbers = #tpu.dot_dimension_numbers<[1], [0], [0], [1], [0, 0, 1, 1], [], []>} : vector<256x128xf32>, vector<128x128xf32>, vector<256x128xf32> -> vector<256x128xf32>
    %28 = arith.addf %22, %27 : vector<256x128xf32>
    %29 = vector.extract_strided_slice %5 {offsets = [1, 1, 0], sizes = [16, 16, 128], strides = [1, 1, 1]} : vector<18x18x128xf32> to vector<16x16x128xf32>
    %30 = vector.shape_cast %29 : vector<16x16x128xf32> to vector<256x128xf32>
    %c4 = arith.constant 4 : index
    %c0_25 = arith.constant 0 : index
    %c0_26 = arith.constant 0 : index
    %31 = vector.load %arg2[%c4, %c0_25, %c0_26] : memref<9x128x128xf32, #tpu.memory_space<vmem>>, vector<1x128x128xf32>
    %32 = vector.shape_cast %31 : vector<1x128x128xf32> to vector<128x128xf32>
    %cst_27 = arith.constant dense<0.000000e+00> : vector<256x128xf32>
    %33 = tpu.matmul %30, %32, %cst_27 {dimension_numbers = #tpu.dot_dimension_numbers<[1], [0], [0], [1], [0, 0, 1, 1], [], []>} : vector<256x128xf32>, vector<128x128xf32>, vector<256x128xf32> -> vector<256x128xf32>
    %34 = arith.addf %28, %33 : vector<256x128xf32>
    %35 = vector.extract_strided_slice %5 {offsets = [1, 2, 0], sizes = [16, 16, 128], strides = [1, 1, 1]} : vector<18x18x128xf32> to vector<16x16x128xf32>
    %36 = vector.shape_cast %35 : vector<16x16x128xf32> to vector<256x128xf32>
    %c5 = arith.constant 5 : index
    %c0_28 = arith.constant 0 : index
    %c0_29 = arith.constant 0 : index
    %37 = vector.load %arg2[%c5, %c0_28, %c0_29] : memref<9x128x128xf32, #tpu.memory_space<vmem>>, vector<1x128x128xf32>
    %38 = vector.shape_cast %37 : vector<1x128x128xf32> to vector<128x128xf32>
    %cst_30 = arith.constant dense<0.000000e+00> : vector<256x128xf32>
    %39 = tpu.matmul %36, %38, %cst_30 {dimension_numbers = #tpu.dot_dimension_numbers<[1], [0], [0], [1], [0, 0, 1, 1], [], []>} : vector<256x128xf32>, vector<128x128xf32>, vector<256x128xf32> -> vector<256x128xf32>
    %40 = arith.addf %34, %39 : vector<256x128xf32>
    %41 = vector.extract_strided_slice %5 {offsets = [2, 0, 0], sizes = [16, 16, 128], strides = [1, 1, 1]} : vector<18x18x128xf32> to vector<16x16x128xf32>
    %42 = vector.shape_cast %41 : vector<16x16x128xf32> to vector<256x128xf32>
    %c6 = arith.constant 6 : index
    %c0_31 = arith.constant 0 : index
    %c0_32 = arith.constant 0 : index
    %43 = vector.load %arg2[%c6, %c0_31, %c0_32] : memref<9x128x128xf32, #tpu.memory_space<vmem>>, vector<1x128x128xf32>
    %44 = vector.shape_cast %43 : vector<1x128x128xf32> to vector<128x128xf32>
    %cst_33 = arith.constant dense<0.000000e+00> : vector<256x128xf32>
    %45 = tpu.matmul %42, %44, %cst_33 {dimension_numbers = #tpu.dot_dimension_numbers<[1], [0], [0], [1], [0, 0, 1, 1], [], []>} : vector<256x128xf32>, vector<128x128xf32>, vector<256x128xf32> -> vector<256x128xf32>
    %46 = arith.addf %40, %45 : vector<256x128xf32>
    %47 = vector.extract_strided_slice %5 {offsets = [2, 1, 0], sizes = [16, 16, 128], strides = [1, 1, 1]} : vector<18x18x128xf32> to vector<16x16x128xf32>
    %48 = vector.shape_cast %47 : vector<16x16x128xf32> to vector<256x128xf32>
    %c7 = arith.constant 7 : index
    %c0_34 = arith.constant 0 : index
    %c0_35 = arith.constant 0 : index
    %49 = vector.load %arg2[%c7, %c0_34, %c0_35] : memref<9x128x128xf32, #tpu.memory_space<vmem>>, vector<1x128x128xf32>
    %50 = vector.shape_cast %49 : vector<1x128x128xf32> to vector<128x128xf32>
    %cst_36 = arith.constant dense<0.000000e+00> : vector<256x128xf32>
    %51 = tpu.matmul %48, %50, %cst_36 {dimension_numbers = #tpu.dot_dimension_numbers<[1], [0], [0], [1], [0, 0, 1, 1], [], []>} : vector<256x128xf32>, vector<128x128xf32>, vector<256x128xf32> -> vector<256x128xf32>
    %52 = arith.addf %46, %51 : vector<256x128xf32>
    %53 = vector.extract_strided_slice %5 {offsets = [2, 2, 0], sizes = [16, 16, 128], strides = [1, 1, 1]} : vector<18x18x128xf32> to vector<16x16x128xf32>
    %54 = vector.shape_cast %53 : vector<16x16x128xf32> to vector<256x128xf32>
    %c8 = arith.constant 8 : index
    %c0_37 = arith.constant 0 : index
    %c0_38 = arith.constant 0 : index
    %55 = vector.load %arg2[%c8, %c0_37, %c0_38] : memref<9x128x128xf32, #tpu.memory_space<vmem>>, vector<1x128x128xf32>
    %56 = vector.shape_cast %55 : vector<1x128x128xf32> to vector<128x128xf32>
    %cst_39 = arith.constant dense<0.000000e+00> : vector<256x128xf32>
    %57 = tpu.matmul %54, %56, %cst_39 {dimension_numbers = #tpu.dot_dimension_numbers<[1], [0], [0], [1], [0, 0, 1, 1], [], []>} : vector<256x128xf32>, vector<128x128xf32>, vector<256x128xf32> -> vector<256x128xf32>
    %58 = arith.addf %52, %57 : vector<256x128xf32>
    %59 = vector.shape_cast %58 : vector<256x128xf32> to vector<16x16x128xf32>
    %c0_40 = arith.constant 0 : index
    %c0_41 = arith.constant 0 : index
    %c0_42 = arith.constant 0 : index
    %c0_43 = arith.constant 0 : index
    %60 = vector.load %arg3[%c0_40, %c0_41, %c0_42, %c0_43] : memref<1x16x16x128xf32, #tpu.memory_space<vmem>>, vector<1x16x16x128xf32>
    %61 = vector.shape_cast %60 : vector<1x16x16x128xf32> to vector<16x16x128xf32>
    %62 = vector.shape_cast %59 : vector<16x16x128xf32> to vector<1x16x16x128xf32>
    tpu.vector_store %arg3[%c0_40, %c0_41, %c0_42, %c0_43], %62 {strides = array<i32>} : memref<1x16x16x128xf32, #tpu.memory_space<vmem>>, vector<1x16x16x128xf32>,
    %cst_44 = arith.constant dense<0.000000e+00> : vector<128xf32>
    %63 = vector.multi_reduction <add>, %58, %cst_44 [0] : vector<256x128xf32> to vector<128xf32>
    %64 = vector.shape_cast %63 : vector<128xf32> to vector<1x128xf32>
    %65 = arith.mulf %58, %58 : vector<256x128xf32>
    %cst_45 = arith.constant dense<0.000000e+00> : vector<128xf32>
    %66 = vector.multi_reduction <add>, %65, %cst_45 [0] : vector<256x128xf32> to vector<128xf32>
    %67 = vector.shape_cast %66 : vector<128xf32> to vector<1x128xf32>
    %68 = tpu.iota {dimensions = array<i32: 0>} : vector<8x128xi32>
    %c2_i32 = arith.constant 2 : i32
    %c0_i32 = arith.constant 0 : i32
    %69 = arith.cmpi eq, %c2_i32, %c0_i32 : i32
    %c1_i32 = arith.constant 1 : i32
    %70 = arith.select %69, %c1_i32, %c2_i32 : i32
    %71 = vector.broadcast %70 : i32 to vector<8x128xi32>
    %72 = arith.remsi %68, %71 : vector<8x128xi32>
    %c0_i32_46 = arith.constant 0 : i32
    %73 = vector.broadcast %c0_i32_46 : i32 to vector<8x128xi32>
    %74 = arith.cmpi ne, %72, %73 : vector<8x128xi32>
    %c0_i32_47 = arith.constant 0 : i32
    %75 = vector.broadcast %c0_i32_47 : i32 to vector<8x128xi32>
    %76 = arith.cmpi slt, %72, %75 : vector<8x128xi32>
    %c0_i32_48 = arith.constant 0 : i32
    %77 = arith.cmpi slt, %70, %c0_i32_48 : i32
    %78 = vector.broadcast %77 : i1 to vector<8x128xi1>
    %79 = vector.broadcast %78 : vector<8x128xi1> to vector<8x128xi1>
    %80 = arith.xori %76, %79 : vector<8x128xi1>
    %81 = arith.andi %80, %74 : vector<8x128xi1>
    %82 = vector.broadcast %70 : i32 to vector<8x128xi32>
    %83 = arith.addi %72, %82 : vector<8x128xi32>
    %84 = arith.select %81, %83, %72 : vector<8x128xi1>, vector<8x128xi32>
    %c0_i32_49 = arith.constant 0 : i32
    %85 = vector.broadcast %c0_i32_49 : i32 to vector<8x128xi32>
    %86 = arith.cmpi eq, %84, %85 : vector<8x128xi32>
    %87 = vector.shape_cast %64 : vector<1x128xf32> to vector<1x128xf32>
    %88 = vector.broadcast %87 : vector<1x128xf32> to vector<8x128xf32>
    %89 = vector.shape_cast %67 : vector<1x128xf32> to vector<1x128xf32>
    %90 = vector.broadcast %89 : vector<1x128xf32> to vector<8x128xf32>
    %91 = arith.select %86, %88, %90 : vector<8x128xi1>, vector<8x128xf32>
    %c0_50 = arith.constant 0 : index
    %c0_51 = arith.constant 0 : index
    %c0_52 = arith.constant 0 : index
    %92 = vector.load %arg4[%c0_50, %c0_51, %c0_52] : memref<1x8x128xf32, #tpu.memory_space<vmem>>, vector<1x8x128xf32>
    %93 = vector.shape_cast %92 : vector<1x8x128xf32> to vector<8x128xf32>
    %94 = vector.shape_cast %91 : vector<8x128xf32> to vector<1x8x128xf32>
    tpu.vector_store %arg4[%c0_50, %c0_51, %c0_52], %94 {strides = array<i32>} : memref<1x8x128xf32, #tpu.memory_space<vmem>>, vector<1x8x128xf32>,
    return
  }
  func.func @transform_0(%arg0: i32) -> (i32, i32, i32, i32) {
    %c0_i32 = arith.constant 0 : i32
    %c0_i32_0 = arith.constant 0 : i32
    %c0_i32_1 = arith.constant 0 : i32
    %c0_i32_2 = arith.constant 0 : i32
    return %arg0, %c0_i32, %c0_i32_0, %c0_i32_1 : i32, i32, i32, i32
  }
  func.func @transform_1(%arg0: i32) -> (i32, i32, i32) {
    %c0_i32 = arith.constant 0 : i32
    %c0_i32_0 = arith.constant 0 : i32
    %c0_i32_1 = arith.constant 0 : i32
    %c0_i32_2 = arith.constant 0 : i32
    return %c0_i32, %c0_i32_0, %c0_i32_1 : i32, i32, i32
  }
  func.func @transform_2(%arg0: i32) -> (i32, i32, i32, i32) {
    %c0_i32 = arith.constant 0 : i32
    %c0_i32_0 = arith.constant 0 : i32
    %c0_i32_1 = arith.constant 0 : i32
    %c0_i32_2 = arith.constant 0 : i32
    return %arg0, %c0_i32, %c0_i32_0, %c0_i32_1 : i32, i32, i32, i32
  }
  func.func @transform_3(%arg0: i32) -> (i32, i32, i32) {
    %c0_i32 = arith.constant 0 : i32
    %c0_i32_0 = arith.constant 0 : i32
    %c0_i32_1 = arith.constant 0 : i32
    return %arg0, %c0_i32, %c0_i32_0 : i32, i32, i32
  }
}

</mosaic_0001>

<bundles_post_ra>
// kernel: tpu_custom_call.1
= control target key start
LH: loop header
LB: loop body
LE: loop exit
PB: predicated region body
PF: predicated region fallthrough
CT: control target
= control target key end

     0   :  { %9 = vsyncpa [#allocation4], 0  ;;  %s6497_s0 = inlined_call_operand.hbm [shape: f32[2,16,16,4], index: 0, kind: input, shape index: {}]   ;;  %s6498_s1 = inlined_call_operand.hbm [shape: f32[9,128,128], index: 1, kind: input, shape index: {}]   ;;  %s6499_s2 = inlined_call_operand.hbm [shape: f32[2,16,16,128], index: 2, kind: output, shape index: {0}]   ;;  %s6500_s3 = inlined_call_operand.hbm [shape: f32[2,8,128], index: 3, kind: output, shape index: {1}]  }
   0x1   :  { %11 = vsyncpa [#allocation4 + $0x1], 0 }
   0x2   :  { %12 = vsyncpa [#allocation7], 0 }
   0x3   :  { %13 = vsyncpa [#allocation5], 0 }
   0x4   :  { %15 = vsyncpa [#allocation5 + $0x1], 0 }
   0x5   :  { %16 = vsyncpa [#allocation10], 0 }
   0x6   :  { %18 = vsyncpa [#allocation10 + $0x1], 0  ;;  %s5417_s12 = smov 0   ;;  %s5419_s13 = smov 0  }
   0x7   :  { %s5421_s14 = smov 0   ;;  %s5423_s15 = smov 0  }
   0x8 LB: > { %s5438_s16 = sadd.s32 4294967295, %s5386_s15   ;;  %s3400_s17 = sadd.s32 4294967294, %s5386_s15   ;;  %s5386_s15 = sphi %s5423_s15, %s6709_s15   ;;  %s5382_s14 = sphi %s5421_s14, %s6708_s14   ;;  %s5378_s13 = sphi %s5419_s13, %s6707_s13   ;;  %s5374_s12 = sphi %s5417_s12, %s6706_s12  }
   0x9   : > { %p44_p0 = scmp.ne.s32.totalorder %s5378_s13, %s5374_s12  ;;  %p6501_p1 = scmp.eq.s32.totalorder %s5438_s16, 0 }
   0xa   : > { %p95_p3 = scmp.eq.s32.totalorder %s3400_s17, 1  ;;  %p3401_p5 = scmp.ge.s32.totalorder %s5386_s15, 1 }
   0xb   : > { %p5447_p4 = por %p6501_p1, %p44_p0  ;;  %p128_p7 = scmp.lt.s32.totalorder %s5386_s15, 3 }
   0xc   : > { %p5452_p6 = por %p95_p3, %p44_p0  ;;  %s5388_s21 = smov [#allocation6]  }
   0xd   : > { %s6591_s18 = scalar_select %p5447_p4, 1, 0 }
   0xe   : > { %s6592_s19 = scalar_select %p5452_p6, 1, 0 }
   0xf   : > { %p5457_p8 = pnand %p3401_p5, %p128_p7  ;;  %s140_s22 = sshll.u32 %s5388_s21, 4  ;;  %s5461_s22 = int_to_ptr.vmem [resolvable:$true] %s140_s22 }
  0x10   : > { %s5473_s24 = sadd.s32 1, %s5386_s15   ;;  %s31_s25 = sadd.s32 1, %s5382_s14 }
  0x11   : > { %s6593_s20 = scalar_select %p5457_p8, 1, 0 }
  0x12   : > { %p5143_p9 = pneg %p5457_p8  ;;  %s28_s26 = ssub.s32 %s5386_s15, %s5473_s24 }
  0x13   : > { %s5226_s29 = scalar_lea.hbm %s6498_s1, 18432 }
  0x14   : > { %p5468_p11 = pnand %p5143_p9, %p6501_p1  ;;  %p5227_p12 = scmp.ne.s32.totalorder %s6498_s1, %s5226_s29 }
  0x15   : > { %p5233_p5 = scmp.lt.u32.totalorder %s5226_s29, %s6498_s1 }
  0x16   : > { %p5228_p13 = pneg %p5468_p11 }
  0x18   : > { %p5229_p0 = pnand %p5228_p13, %p5227_p12 }
  0x1a   : > { %p5230_p3 = pneg %p5229_p0 }
  0x1c   : > { %p5235_p7 = pnand %p5233_p5, %p5230_p3 }
  0x1e   : > { %5238 = shalt.err (!%p5235_p7)
}
  0x1f   : > { %s5239_s7 = scalar_lea.vmem %s5461_s22, 18432  ;;  %p5247_p2 = scmp.lt.s32.totalorder %s5461_s22, %s5461_s22 }
  0x20   : > { %p5240_p9 = scmp.ne.s32.totalorder %s5461_s22, %s5239_s7  ;;  %p5248_p6 = scmp.lt.s32.totalorder %s5239_s7, %s5239_s7 }
  0x22   : > { %p5242_p10 = pnand %p5240_p9, %p5228_p13  ;;  %p5249_p4 = por %p5248_p6, %p5247_p2 }
  0x24   : > { %p5243_p1 = pneg %p5242_p10 }
  0x26   : > { %p5250_p8 = pnand %p5249_p4, %p5243_p1 }
  0x28   : > { %5253 = shalt.err (!%p5250_p8)
}
  0x29   : > { %s5389_s8 = smov 128   ;;  %s5390_s9 = smov 8  }
  0x2a   : > { %5146 = dma.hbm_to_vmem [thread:$0]  (!%p5468_p11), %s6498_s1, 18432, %s5461_s22, [#allocation7], %s5389_s8, %s5389_s8, %s5390_s9  }
  0x2b   : > { %p29_p1 = scmp.eq.s32.totalorder %s28_s26, 0  ;;  %p38_p2 = scmp.ne.s32.totalorder %s5382_s14, %s5378_s13 }
  0x2c   : > { %p39_p4 = scmp.eq.s32.totalorder %s5386_s15, 0  ;;  %p5159_p6 = scmp.lt.s32.totalorder %s5386_s15, 2 }
  0x2d   : > { %s5507_s17 = scalar_select %p29_p1, %s5382_s14, %s31_s25  }
  0x2e   : > { %p40_p8 = por %p39_p4, %p38_p2  ;;  %p6595_p10 = scmp.eq.s32.totalorder %s5438_s16, 1 }
  0x2f   : > { %s154_s23 = sand.u32 1, %s5382_s14   ;;  %s3419_s27 = sshll.u32 %s5386_s15, 12 }
  0x30   : > { %p5511_p12 = por %p6595_p10, %p38_p2  ;;  %s3404_s28 = sshll.u32 %s154_s23, 8 }
  0x31   : > { %s5520_s4 = scalar_lea.hbm %s6497_s0, %s3419_s27  ;;  %s158_s22 = scalar_lea.vmem [#allocation3], %s3404_s28 }
  0x32   : > { %s165_s25 = sshll.u32 %s158_s22, 4  ;;  %p5522_p11 = pnand %p5159_p6, %p40_p8  ;;  %s5526_s25 = int_to_ptr.vmem [resolvable:$true] %s165_s25 }
  0x33   : > { %s5528_s5 = scalar_lea.sflag [#allocation4], %s154_s23  ;;  %s5254_s6 = scalar_lea.hbm %s5520_s4, 4096 }
  0x34   : > { %p5255_p13 = scmp.ne.s32.totalorder %s5520_s4, %s5254_s6  ;;  %p5256_p0 = pneg %p5522_p11 }
  0x35   : > { %s5259_s11 = scalar_lea.hbm %s6497_s0, 8192  ;;  %p5260_p7 = scmp.lt.u32.totalorder %s5520_s4, %s6497_s0 }
  0x36   : > { %p5257_p3 = pnand %p5256_p0, %p5255_p13  ;;  %p5261_p9 = scmp.lt.u32.totalorder %s5259_s11, %s5254_s6 }
  0x37   : > { %p5263_p2 = scmp.lt.u32.totalorder %s5254_s6, %s5520_s4 }
  0x38   : > { %p5258_p5 = pneg %p5257_p3  ;;  %p5262_p1 = por %p5261_p9, %p5260_p7 }
  0x3a   : > { %p5264_p4 = por %p5263_p2, %p5262_p1 }
  0x3c   : > { %p5265_p6 = pnand %p5264_p4, %p5258_p5 }
  0x3e   : > { %5268 = shalt.err (!%p5265_p6)
}
  0x3f   : > { %s5269_s23 = scalar_lea.vmem %s5526_s25, 4096  ;;  %s5391_s29 = smov [#allocation3]  }
  0x40   : > { %p5270_p8 = scmp.ne.s32.totalorder %s5526_s25, %s5269_s23  ;;  %s5274_s30 = sshll.u32 %s5391_s29, 4  ;;  %s5275_s30 = int_to_ptr.vmem [resolvable:$false] %s5274_s30 }
  0x41   : > { %s5276_s22 = scalar_lea.vmem %s5275_s30, 8192  ;;  %p5277_p3 = scmp.lt.s32.totalorder %s5526_s25, %s5275_s30 }
  0x42   : > { %p5272_p10 = pnand %p5270_p8, %p5256_p0  ;;  %p5278_p7 = scmp.lt.s32.totalorder %s5276_s22, %s5269_s23 }
  0x44   : > { %p5273_p13 = pneg %p5272_p10  ;;  %p5279_p9 = por %p5278_p7, %p5277_p3 }
  0x46   : > { %p5280_p1 = pnand %p5279_p9, %p5273_p13 }
  0x48   : > { %5283 = shalt.err (!%p5280_p1)
}
  0x49   : > { %5150 = dma.hbm_to_vmem [thread:$0]  (!%p5522_p11), %s5520_s4, 4096, %s5526_s25, %s5528_s5, %s5389_s8, %s5389_s8, %s5390_s9  }
  0x4a   : > { %p6598_p0 = scmp.ne.s32.totalorder %s6593_s20, 0 }
  0x4c   : > { %177 = sbr.rel (%p6598_p0) target bundleno = 674 (0x2a2), region = 28 }
  0x53   : > { %s5562_s6 = sand.u32 1, %s5378_s13   ;;  %p6599_p5 = scmp.ne.s32.totalorder %s6591_s18, 0 }
  0x54   : > { %s3408_s7 = sshll.u32 %s5562_s6, 8  ;;  %s180_s10 = scalar_lea.sflag [#allocation4], %s5562_s6 }
  0x55   : > { %s5568_s26 = scalar_lea.vmem [#allocation3], %s3408_s7 }
  0x56   : > { %5357 = dma.done.wait (%p6599_p5), %s180_s10, 4096  }
  0x57   : > { %5359 = vsyncadd (%p6599_p5), %s180_s10, 4294963200  ;;  %p6600_p11 = scmp.eq.s32.totalorder %s5438_s16, 0 }
  0x59   : > { %5361 = dma.done.wait (%p6600_p11), [#allocation7], 18432   ;;  %p6601_p2 = pmov %p6600_p11 }
  0x5a   : > { %vm453_vm0 = vcmask 1046528   ;;  %v5392_v0 = vmov 0.0   ;;  %v567_v2 = vld [vmem:[#allocation6 + $0x80] sm:$0xff]  ;;  %v568_v3 = vld [vmem:[#allocation6 + $0x88] sm:$0xff]  ;;  %v569_v7 = vld [vmem:[#allocation6 + $0x90] sm:$0xff]  ;;  %vm302_vm1 = vcmask 31744  }
  0x5b   : > { %5363 = vsyncadd (%p6601_p2), [#allocation7], 4294948864  ;;  %215 = vst [vmem:[#allocation2] sm:$0xff] %v5392_v0  ;;  %v5578_v1 = vrot.slane %v5392_v0, 1  ;;  %v1705_v4 = vld [vmem:[#allocation6 + $0x200] sm:$0xff]  ;;  %v4573_v5 = vpack.c.bf16 %v568_v3, %v567_v2  ;;  %v1706_v6 = vld [vmem:[#allocation6 + $0x208] sm:$0xff] }
  0x5c   : > { %217 = vst [vmem:[#allocation2 + $0x10] sm:$0x3] %v5392_v0  ;;  %218 = vst [vmem:[#allocation2 + $0x18] sm:$0xff] %v5392_v0  ;;  %v570_v8 = vld [vmem:[#allocation6 + $0x98] sm:$0xff]  ;;  %v5581_v9 = vpack.c.bf16 %v1706_v6, %v1705_v4  ;;  %v1707_v11 = vld [vmem:[#allocation6 + $0x210] sm:$0xff]  ;;  %vm1033_vm2 = vcmask 1045504  }
  0x5d   : > { %219 = vst [vmem:[#allocation2 + $0x20] sm:$0xff] %v5392_v0  ;;  %220 = vst [vmem:[#allocation2 + $0x28] sm:$0x3] %v5392_v0  ;;  %3885 = vmatprep.mubr.f32.mxu1 %v5578_v1  ;;  %v4577_v10 = vpack.c.bf16 %v570_v8, %v569_v7  ;;  %v1708_v12 = vld [vmem:[#allocation6 + $0x218] sm:$0xff]  ;;  %v571_v13 = vld [vmem:[#allocation6 + $0xa0] sm:$0xff]  ;;  %4574 = vmatprep.subr.bf16.mxu1 %v4573_v5  ;;  %s6376_s18 = scalar_lea.vmem [#allocation8], %s3408_s7 }
  0x5e   : > { %221 = vst [vmem:[#allocation2 + $0x30] sm:$0xff] %v5392_v0  ;;  %222 = vst [vmem:[#allocation2 + $0x38] sm:$0xff] %v5392_v0  ;;  %v5583_v14 = vpack.c.bf16 %v1708_v12, %v1707_v11  ;;  %v572_v15 = vld [vmem:[#allocation6 + $0xa8] sm:$0xff]  ;;  %v1709_v16 = vld [vmem:[#allocation6 + $0x220] sm:$0xff]  ;;  %4702 = vmatprep.subr.bf16.mxu0 %v5581_v9  ;;  %4576 = vmatpush3.bf16.msra.mxu1 %v4573_v5  ;;  %s3420_s20 = sshll.u32 %s5438_s16, 12  ;;  %s3272_s8 = sshll.u32 %s6376_s18, 4  ;;  %s6420_s8 = int_to_ptr.vmem [resolvable:$true] %s3272_s8 }
  0x5f   : > { %223 = vst [vmem:[#allocation2 + $0x40] sm:$0x3] %v5392_v0  ;;  %224 = vst [vmem:[#allocation2 + $0x48] sm:$0xff] %v5392_v0  ;;  %v1710_v17 = vld [vmem:[#allocation6 + $0x228] sm:$0xff]  ;;  %4704 = vmatpush3.bf16.msra.mxu0 %v5581_v9  ;;  %4578 = vmatprep.subr.bf16.mxu1 %v4577_v10  ;;  %v4581_v18 = vpack.c.bf16 %v572_v15, %v571_v13  ;;  %v573_v20 = vld [vmem:[#allocation6 + $0xb0] sm:$0xff]  ;;  %s6418_s25 = scalar_lea.hbm %s6499_s2, %s3420_s20  ;;  %s3254_s5 = scalar_lea.sflag [#allocation5], %s5562_s6 }
  0x60   : > { %225 = vst [vmem:[#allocation2 + $0x50] sm:$0xff] %v5392_v0  ;;  %226 = vst [vmem:[#allocation2 + $0x58] sm:$0x3] %v5392_v0  ;;  %4706 = vmatprep.subr.bf16.mxu0 %v5583_v14  ;;  %v5588_v19 = vpack.c.bf16 %v1710_v17, %v1709_v16  ;;  %v574_v21 = vld [vmem:[#allocation6 + $0xb8] sm:$0xff]  ;;  %v1711_v22 = vld [vmem:[#allocation6 + $0x230] sm:$0xff]  ;;  %s5284_s11 = scalar_lea.vmem %s6420_s8, 4096 }
  0x61   : > { %227 = vst [vmem:[#allocation2 + $0x60] sm:$0xff] %v5392_v0  ;;  %228 = vst [vmem:[#allocation2 + $0x68] sm:$0xff] %v5392_v0  ;;  %v1712_v23 = vld [vmem:[#allocation6 + $0x238] sm:$0xff]  ;;  %v4585_v24 = vpack.c.bf16 %v574_v21, %v573_v20  ;;  %v575_v26 = vld [vmem:[#allocation6 + $0xc0] sm:$0xff]  ;;  %p5285_p4 = scmp.ne.s32.totalorder %s6420_s8, %s5284_s11  ;;  %s5393_s27 = smov [#allocation8]  }
  0x62   : > { %229 = vst [vmem:[#allocation2 + $0x70] sm:$0x3] %v5392_v0  ;;  %230 = vst [vmem:[#allocation2 + $0x78] sm:$0xff] %v5392_v0  ;;  %4580 = vmatpush3.bf16.msra.mxu1 %v4577_v10  ;;  %v5592_v25 = vpack.c.bf16 %v1712_v23, %v1711_v22  ;;  %v576_v27 = vld [vmem:[#allocation6 + $0xc8] sm:$0xff]  ;;  %v269_v28 = vld [vmem:[%s5568_s26] sm:$0xff]  ;;  %s5288_s28 = sshll.u32 %s5393_s27, 4  ;;  %s5289_s28 = int_to_ptr.vmem [resolvable:$false] %s5288_s28 }
  0x63   : > { %231 = vst [vmem:[#allocation2 + $0x80] sm:$0xff] %v5392_v0  ;;  %232 = vst [vmem:[#allocation2 + $0x88] sm:$0x3] %v5392_v0  ;;  %4708 = vmatpush3.bf16.msra.mxu0 %v5583_v14  ;;  %4582 = vmatprep.subr.bf16.mxu1 %v4581_v18  ;;  %v1713_v29 = vld [vmem:[#allocation6 + $0x240] sm:$0xff]  ;;  %v1714_v30 = vld [vmem:[#allocation6 + $0x248] sm:$0xff]  ;;  %v4589_v32 = vpack.c.bf16 %v576_v27, %v575_v26  ;;  %p5286_p6 = pnand %p5285_p4, %p5511_p12  ;;  %s5290_s23 = scalar_lea.vmem %s5289_s28, 8192 }
  0x64   : > { %233 = vst [vmem:[#allocation2 + $0x90] sm:$0xff] %v5392_v0  ;;  %234 = vst [vmem:[#allocation2 + $0x98] sm:$0xff] %v5392_v0  ;;  %4710 = vmatprep.subr.bf16.mxu0 %v5588_v19  ;;  %v270_v31 = vld [vmem:[%s5568_s26 + $0x8] sm:$0xff]  ;;  %v577_v33 = vld [vmem:[#allocation6 + $0xd0] sm:$0xff]  ;;  %v5602_v36 = vpack.c.bf16 %v1714_v30, %v1713_v29  ;;  %p5291_p10 = scmp.lt.s32.totalorder %s6420_s8, %s5289_s28  ;;  %p5292_p13 = scmp.lt.s32.totalorder %s5290_s23, %s5284_s11 }
  0x65   : > { %235 = vst [vmem:[#allocation2 + $0xa0] sm:$0x3] %v5392_v0  ;;  %236 = vst [vmem:[#allocation2 + $0xa8] sm:$0xff] %v5392_v0  ;;  %v271_v34 = vld [vmem:[%s5568_s26 + $0x10] sm:$0xff]  ;;  %v272_v35 = vld [vmem:[%s5568_s26 + $0x18] sm:$0xff]  ;;  %p5287_p8 = pneg %p5286_p6 }
  0x66   : > { %237 = vst [vmem:[#allocation2 + $0xb0] sm:$0xff] %v5392_v0  ;;  %238 = vst [vmem:[#allocation2 + $0xb8] sm:$0x3] %v5392_v0  ;;  %4584 = vmatpush3.bf16.msra.mxu1 %v4581_v18  ;;  %v578_v37 = vld [vmem:[#allocation6 + $0xd8] sm:$0xff]  ;;  %v273_v38 = vld [vmem:[%s5568_s26 + $0x20] sm:$0xff]  ;;  %p5293_p3 = por %p5292_p13, %p5291_p10 }
  0x67   : > { %239 = vst [vmem:[#allocation2 + $0xc0] sm:$0xff] %v5392_v0  ;;  %240 = vst [vmem:[#allocation2 + $0xc8] sm:$0xff] %v5392_v0  ;;  %4712 = vmatpush3.bf16.msra.mxu0 %v5588_v19  ;;  %4586 = vmatprep.subr.bf16.mxu1 %v4585_v24  ;;  %v274_v39 = vld [vmem:[%s5568_s26 + $0x28] sm:$0xff]  ;;  %v1715_v40 = vld [vmem:[#allocation6 + $0x250] sm:$0xff]  ;;  %v4593_v44 = vpack.c.bf16 %v578_v37, %v577_v33 }
  0x68   : > { %241 = vst [vmem:[#allocation2 + $0xd0] sm:$0x3] %v5392_v0  ;;  %242 = vst [vmem:[#allocation2 + $0xd8] sm:$0xff] %v5392_v0  ;;  %4714 = vmatprep.subr.bf16.mxu0 %v5592_v25  ;;  %v1716_v41 = vld [vmem:[#allocation6 + $0x258] sm:$0xff]  ;;  %v275_v42 = vld [vmem:[%s5568_s26 + $0x30] sm:$0xff]  ;;  %p5294_p7 = pnand %p5293_p3, %p5287_p8 }
  0x69   : > { %243 = vst [vmem:[#allocation2 + $0xe0] sm:$0xff] %v5392_v0  ;;  %244 = vst [vmem:[#allocation2 + $0xe8] sm:$0x3] %v5392_v0  ;;  %v276_v43 = vld [vmem:[%s5568_s26 + $0x38] sm:$0xff]  ;;  %v579_v45 = vld [vmem:[#allocation6 + $0xe0] sm:$0xff]  ;;  %v5617_v47 = vpack.c.bf16 %v1716_v41, %v1715_v40 }
  0x6a   : > { %245 = vst [vmem:[#allocation2 + $0xf0] sm:$0xff] %v5392_v0  ;;  %246 = vst [vmem:[#allocation2 + $0xf8] sm:$0xff] %v5392_v0  ;;  %4588 = vmatpush3.bf16.msra.mxu1 %v4585_v24  ;;  %v277_v46 = vld [vmem:[%s5568_s26 + $0x40] sm:$0xff]  ;;  %v580_v48 = vld [vmem:[#allocation6 + $0xe8] sm:$0xff] }
  0x6b   : > { %247 = vst [vmem:[#allocation2 + $0x100] sm:$0x3] %v5392_v0  ;;  %248 = vst [vmem:[#allocation2 + $0x108] sm:$0xff] %v5392_v0  ;;  %4716 = vmatpush3.bf16.msra.mxu0 %v5592_v25  ;;  %4590 = vmatprep.subr.bf16.mxu1 %v4589_v32  ;;  %v278_v50 = vld [vmem:[%s5568_s26 + $0x48] sm:$0xff]  ;;  %v1717_v51 = vld [vmem:[#allocation6 + $0x260] sm:$0xff]  ;;  %v4597_v57 = vpack.c.bf16 %v580_v48, %v579_v45 }
  0x6c   : > { %249 = vst [vmem:[#allocation2 + $0x110] sm:$0xff] %v5392_v0  ;;  %250 = vst [vmem:[#allocation2 + $0x118] sm:$0x3] %v5392_v0  ;;  %4718 = vmatprep.subr.bf16.mxu0 %v5602_v36  ;;  %v1718_v52 = vld [vmem:[#allocation6 + $0x268] sm:$0xff]  ;;  %v279_v56 = vld [vmem:[%s5568_s26 + $0x50] sm:$0xff] }
  0x6d   : > { %251 = vst [vmem:[#allocation2 + $0x120] sm:$0xff] %v5392_v0  ;;  %252 = vst [vmem:[#allocation2 + $0x128] sm:$0xff] %v5392_v0  ;;  %v5632_v58 = vpack.c.bf16 %v1718_v52, %v1717_v51  ;;  %v581_v59 = vld [vmem:[#allocation6 + $0xf0] sm:$0xff]  ;;  %v582_v60 = vld [vmem:[#allocation6 + $0xf8] sm:$0xff] }
  0x6e   : > { %253 = vst [vmem:[#allocation2 + $0x130] sm:$0x3] %v5392_v0  ;;  %254 = vst [vmem:[#allocation2 + $0x138] sm:$0xff] %v5392_v0  ;;  %4592 = vmatpush3.bf16.msra.mxu1 %v4589_v32  ;;  %v1719_v62 = vld [vmem:[#allocation6 + $0x270] sm:$0xff]  ;;  %v1720_v63 = vld [vmem:[#allocation6 + $0x278] sm:$0xff]  ;;  %v4601_v2 = vpack.c.bf16 %v582_v60, %v581_v59 }
  0x6f   : > { %255 = vst [vmem:[#allocation2 + $0x140] sm:$0xff] %v5392_v0  ;;  %256 = vst [vmem:[#allocation2 + $0x148] sm:$0x3] %v5392_v0  ;;  %4720 = vmatpush3.bf16.msra.mxu0 %v5602_v36  ;;  %4594 = vmatprep.subr.bf16.mxu1 %v4593_v44  ;;  %v337_v3 = vld [vmem:[#allocation2 + $0x10] sm:$0x3]  ;;  %v5643_v5 = vpack.c.bf16 %v1720_v63, %v1719_v62  ;;  %v390_v7 = vld [vmem:[#allocation6 + $0x8] sm:$0xff] }
  0x70   : > { %257 = vst [vmem:[#allocation2 + $0x150] sm:$0xff] %v5392_v0  ;;  %258 = vst [vmem:[#allocation2 + $0x158] sm:$0xff] %v5392_v0  ;;  %4722 = vmatprep.subr.bf16.mxu0 %v5617_v47  ;;  %v281_v4 = vld [vmem:[%s5568_s26 + $0x60] sm:$0xff]  ;;  %v1987_v11 = vld [vmem:[#allocation6 + $0x288] sm:$0xff]  ;;  %v457_v13 = vrot.slane %v337_v3, 1 }
  0x71   : > { %259 = vst [vmem:[#allocation2 + $0x160] sm:$0x3] %v5392_v0  ;;  %260 = vst [vmem:[#allocation2 + $0x168] sm:$0xff] %v5392_v0  ;;  %v389_v6 = vld [vmem:[#allocation6] sm:$0xff]  ;;  %v282_v12 = vld [vmem:[%s5568_s26 + $0x68] sm:$0xff] }
  0x72   : > { %261 = vst [vmem:[#allocation2 + $0x170] sm:$0xff] %v5392_v0  ;;  %262 = vst [vmem:[#allocation2 + $0x178] sm:$0x3] %v5392_v0  ;;  %4596 = vmatpush3.bf16.msra.mxu1 %v4593_v44  ;;  %v1986_v10 = vld [vmem:[#allocation6 + $0x280] sm:$0xff]  ;;  %v4605_v17 = vpack.c.bf16 %v390_v7, %v389_v6  ;;  %v283_v20 = vld [vmem:[%s5568_s26 + $0x70] sm:$0xff]  ;;  %v458_v32 = vsel %vm453_vm0, %v5578_v1, %v457_v13 }
  0x73   : > { %263 = vst [vmem:[#allocation2 + $0x180] sm:$0xff] %v5392_v0  ;;  %264 = vst [vmem:[#allocation2 + $0x188] sm:$0xff] %v5392_v0  ;;  %4724 = vmatpush3.bf16.msra.mxu0 %v5617_v47  ;;  %4598 = vmatprep.subr.bf16.mxu1 %v4597_v57  ;;  %v284_v21 = vld [vmem:[%s5568_s26 + $0x78] sm:$0xff]  ;;  %v4733_v22 = vpack.c.bf16 %v1987_v11, %v1986_v10  ;;  %v1988_v24 = vld [vmem:[#allocation6 + $0x290] sm:$0xff] }
  0x74   : > { %265 = vst [vmem:[#allocation2 + $0x190] sm:$0x3] %v5392_v0  ;;  %268 = vst [vmem:[#allocation2 + $0x1a8] sm:$0x3] %v5392_v0  ;;  %v280_v0 = vld [vmem:[%s5568_s26 + $0x58] sm:$0xff]  ;;  %4726 = vmatprep.subr.bf16.mxu0 %v5632_v58  ;;  %v287_v40 = vld [vmem:[%s5568_s26 + $0x90] sm:$0xff] }
  0x75   : > { %6602 = vst [vmem:[#allocation15_spill] sm:$0xff] %v5581_v9  ;;  %6603 = vst [vmem:[#allocation16_spill] sm:$0xff] %v5583_v14  ;;  %v1989_v26 = vld [vmem:[#allocation6 + $0x298] sm:$0xff]  ;;  %v1991_v45 = vld [vmem:[#allocation6 + $0x2a8] sm:$0xff] }
  0x76   : > { %6604 = vst [vmem:[#allocation17_spill] sm:$0xff] %v5588_v19  ;;  %6605 = vst [vmem:[#allocation18_spill] sm:$0xff] %v5592_v25  ;;  %4600 = vmatpush3.bf16.msra.mxu1 %v4597_v57  ;;  %v392_v33 = vld [vmem:[#allocation6 + $0x18] sm:$0xff]  ;;  %v291_v57 = vld [vmem:[%s5568_s26 + $0xb0] sm:$0xff] }
  0x77   : > { %303 = vst.msk [vmem:[#allocation2 + $0x19] sm:$0xff] %vm302_vm1, %v269_v28  ;;  %304 = vst.msk [vmem:[#allocation2 + $0x21] sm:$0xff] %vm302_vm1, %v270_v31  ;;  %4728 = vmatpush3.bf16.msra.mxu0 %v5632_v58  ;;  %4602 = vmatprep.subr.bf16.mxu1 %v4601_v2  ;;  %v391_v31 = vld [vmem:[#allocation6 + $0x10] sm:$0xff]  ;;  %v288_v41 = vld [vmem:[%s5568_s26 + $0x98] sm:$0xff] }
  0x78   : > { %6606 = vst [vmem:[#allocation19_spill] sm:$0xff] %v5602_v36  ;;  %305 = vst.msk [vmem:[#allocation2 + $0x31] sm:$0xff] %vm302_vm1, %v271_v34  ;;  %4730 = vmatprep.subr.bf16.mxu0 %v5643_v5  ;;  %v285_v34 = vld [vmem:[%s5568_s26 + $0x80] sm:$0xff]  ;;  %v1992_v62 = vld [vmem:[#allocation6 + $0x2b0] sm:$0xff] }
  0x79   : > { %306 = vst.msk [vmem:[#allocation2 + $0x39] sm:$0xff] %vm302_vm1, %v272_v35  ;;  %307 = vst.msk [vmem:[#allocation2 + $0x49] sm:$0xff] %vm302_vm1, %v273_v38  ;;  %v286_v35 = vld [vmem:[%s5568_s26 + $0x88] sm:$0xff]  ;;  %v292_v6 = vld [vmem:[%s5568_s26 + $0xb8] sm:$0xff] }
  0x7a   : > { %308 = vst.msk [vmem:[#allocation2 + $0x51] sm:$0xff] %vm302_vm1, %v274_v39  ;;  %309 = vst.msk [vmem:[#allocation2 + $0x61] sm:$0xff] %vm302_vm1, %v275_v42  ;;  %4604 = vmatpush3.bf16.msra.mxu1 %v4601_v2  ;;  %v1990_v39 = vld [vmem:[#allocation6 + $0x2a0] sm:$0xff]  ;;  %v4737_v42 = vpack.c.bf16 %v1989_v26, %v1988_v24  ;;  %v395_v13 = vld [vmem:[#allocation6 + $0x30] sm:$0xff] }
  0x7b   : > { %310 = vst.msk [vmem:[#allocation2 + $0x69] sm:$0xff] %vm302_vm1, %v276_v43  ;;  %6607 = vst [vmem:[#allocation20_spill] sm:$0xff] %v5617_v47  ;;  %4732 = vmatpush3.bf16.msra.mxu0 %v5643_v5  ;;  %4606 = vmatprep.subr.bf16.mxu1 %v4605_v17  ;;  %v2271_v9 = vld [vmem:[#allocation6 + $0x358] sm:$0xff] }
  0x7c   : > { %311 = vst.msk [vmem:[#allocation2 + $0x79] sm:$0xff] %vm302_vm1, %v277_v46  ;;  %312 = vst.msk [vmem:[#allocation2 + $0x81] sm:$0xff] %vm302_vm1, %v278_v50  ;;  %4734 = vmatprep.subr.bf16.mxu0 %v4733_v22  ;;  %v393_v46 = vld [vmem:[#allocation6 + $0x20] sm:$0xff]  ;;  %v4609_v50 = vpack.c.bf16 %v392_v33, %v391_v31  ;;  %v296_v33 = vld [vmem:[%s5568_s26 + $0xd8] sm:$0xff] }
  0x7d   : > { %313 = vst.msk [vmem:[#allocation2 + $0x91] sm:$0xff] %vm302_vm1, %v279_v56  ;;  %6608 = vst [vmem:[#allocation21_spill] sm:$0xff] %v5632_v58  ;;  %3886 = vmatmul.mubr.f32.vlgmr.msra.gmra.mrb[0].mxu1 %v458_v32  ;;  %v290_v56 = vld [vmem:[%s5568_s26 + $0xa8] sm:$0xff]  ;;  %v295_v32 = vld [vmem:[%s5568_s26 + $0xd0] sm:$0xff] }
  0x7e   : > { %v5619_v49 = vld [vmem:[#allocation2 + $0x18] sm:$0xff]  ;;  %v5623_v53 = vld [vmem:[#allocation2 + $0x20] sm:$0xff]  ;;  %314 = vst.msk [vmem:[#allocation2 + $0x99] sm:$0xff] %vm302_vm1, %v280_v0  ;;  %6609 = vst [vmem:[#allocation22_spill] sm:$0xff] %v5643_v5  ;;  %4608 = vmatpush3.bf16.msra.mxu1 %v4605_v17 }
  0x7f   : > { %v459_v54 = vrot.slane %v5619_v49, 1  ;;  %v460_v55 = vrot.slane %v5623_v53, 1  ;;  %v5645_v8 = vld [vmem:[#allocation2 + $0x28] sm:$0x3]  ;;  %315 = vst.msk [vmem:[#allocation2 + $0xa9] sm:$0xff] %vm302_vm1, %v281_v4  ;;  %v5649_v15 = vld [vmem:[#allocation2 + $0x30] sm:$0xff]  ;;  %4610 = vmatprep.subr.bf16.mxu1 %v4609_v50 }
  0x80   : > { %v5651_v16 = vld [vmem:[#allocation2 + $0x38] sm:$0xff]  ;;  %316 = vst.msk [vmem:[#allocation2 + $0xb1] sm:$0xff] %vm302_vm1, %v282_v12  ;;  %v462_v18 = vrot.slane %v5645_v8, 1  ;;  %v5659_v23 = vld [vmem:[#allocation2 + $0x40] sm:$0x3]  ;;  %317 = vst.msk [vmem:[#allocation2 + $0xc1] sm:$0xff] %vm302_vm1, %v283_v20 }
  0x81   : > { %v5635_v61 = vsel %vm453_vm0, %v459_v54, %v460_v55  ;;  %318 = vst.msk [vmem:[#allocation2 + $0xc9] sm:$0xff] %vm302_vm1, %v284_v21  ;;  %v464_v27 = vrot.slane %v5649_v15, 1  ;;  %v465_v28 = vrot.slane %v5651_v16, 1  ;;  %v5665_v29 = vld [vmem:[#allocation2 + $0x48] sm:$0xff]  ;;  %v5667_v30 = vld [vmem:[#allocation2 + $0x50] sm:$0xff]  ;;  %v467_v38 = vrot.slane %v5659_v23, 1 }
  0x82   : > { %4205 = vmatprep.mubr.f32.mxu0 %v5635_v61  ;;  %v463_v37 = vsel %vm453_vm0, %v460_v55, %v462_v18  ;;  %319 = vst.msk [vmem:[#allocation2 + $0xd9] sm:$0xff] %vm302_vm1, %v285_v34  ;;  %320 = vst.msk [vmem:[#allocation2 + $0xe1] sm:$0xff] %vm302_vm1, %v286_v35  ;;  %v469_v1 = vrot.slane %v5665_v29, 1  ;;  %v470_v43 = vrot.slane %v5667_v30, 1  ;;  %v5682_v44 = vld [vmem:[#allocation2 + $0x58] sm:$0x3]  ;;  %3888 = vmatprep.mubr.f32.mxu1 %v5635_v61 }
  0x83   : > { %321 = vst.msk [vmem:[#allocation2 + $0xf1] sm:$0xff] %vm302_vm1, %v287_v40  ;;  %322 = vst.msk [vmem:[#allocation2 + $0xf9] sm:$0xff] %vm302_vm1, %v288_v41  ;;  %v5687_v48 = vsel %vm453_vm0, %v464_v27, %v465_v28  ;;  %v5689_v51 = vld [vmem:[#allocation2 + $0x60] sm:$0xff]  ;;  %v5691_v52 = vld [vmem:[#allocation2 + $0x68] sm:$0xff]  ;;  %4206 = vmatmul.mubr.f32.vlgmr.msra.gmra.mrb[0].mxu0 %v463_v37  ;;  %v5698_v59 = vsel %vm453_vm0, %v465_v28, %v467_v38  ;;  %v472_v60 = vrot.slane %v5682_v44, 1  ;;  %3889 = vmatmul.mubr.f32.gmra.mrb[2].mxu1 %v463_v37 }
  0x84   : > { %6610 = vst [vmem:[#allocation23_spill] sm:$0xff] %v5687_v48  ;;  %v394_v54 = vld [vmem:[#allocation6 + $0x28] sm:$0xff]  ;;  %v289_v55 = vld [vmem:[%s5568_s26 + $0xa0] sm:$0xff]  ;;  %4736 = vmatpush3.bf16.msra.mxu0 %v4733_v22  ;;  %6611 = vst [vmem:[#allocation24_spill] sm:$0xff] %v5698_v59  ;;  %4208 = vmatprep.mubr.f32.mxu0 %v5687_v48  ;;  %v5706_v63 = vsel %vm453_vm0, %v469_v1, %v470_v43  ;;  %v4741_v61 = vpack.c.bf16 %v1991_v45, %v1990_v39  ;;  %v474_v0 = vrot.slane %v5689_v51, 1 }
  0x85   : > { %323 = vst.msk [vmem:[#allocation2 + $0x109] sm:$0xff] %vm302_vm1, %v289_v55  ;;  %324 = vst.msk [vmem:[#allocation2 + $0x111] sm:$0xff] %vm302_vm1, %v290_v56  ;;  %4738 = vmatprep.subr.bf16.mxu0 %v4737_v42  ;;  %v475_v2 = vrot.slane %v5691_v52, 1  ;;  %v5710_v3 = vld [vmem:[#allocation2 + $0x70] sm:$0x3]  ;;  %v1993_v4 = vld [vmem:[#allocation6 + $0x2b8] sm:$0xff]  ;;  %v4613_v11 = vpack.c.bf16 %v394_v54, %v393_v46  ;;  %3891 = vmatprep.mubr.f32.mxu1 %v5687_v48  ;;  %v5724_v18 = vsel %vm453_vm0, %v470_v43, %v472_v60 }
  0x86   : > { %325 = vst.msk [vmem:[#allocation2 + $0x121] sm:$0xff] %vm302_vm1, %v291_v57  ;;  %6612 = vst [vmem:[#allocation25_spill] sm:$0xff] %v5706_v63  ;;  %v5713_v7 = vld [vmem:[#allocation2 + $0x78] sm:$0xff]  ;;  %v5715_v10 = vld [vmem:[#allocation2 + $0x80] sm:$0xff]  ;;  %v477_v20 = vrot.slane %v5710_v3, 1  ;;  %4612 = vmatpush3.bf16.msra.mxu1 %v4609_v50  ;;  %v4745_v26 = vpack.c.bf16 %v1993_v4, %v1992_v62  ;;  %v1044_v47 = vrot.slane %v5649_v15, 2 }
  0x87   : > { %326 = vst.msk [vmem:[#allocation2 + $0x129] sm:$0xff] %vm302_vm1, %v292_v6  ;;  %v293_v12 = vld [vmem:[%s5568_s26 + $0xc0] sm:$0xff]  ;;  %4209 = vmatmul.mubr.f32.gmra.mrb[2].mxu0 %v5698_v59  ;;  %v396_v17 = vld [vmem:[#allocation6 + $0x38] sm:$0xff]  ;;  %6613 = vst [vmem:[#allocation26_spill] sm:$0xff] %v5724_v18  ;;  %v5729_v24 = vsel %vm453_vm0, %v474_v0, %v475_v2  ;;  %v479_v27 = vrot.slane %v5713_v7, 1  ;;  %v480_v28 = vrot.slane %v5715_v10, 1  ;;  %3892 = vmatmul.mubr.f32.gmra.mrb[4].mxu1 %v5698_v59 }
  0x88   : > { %327 = vst.msk [vmem:[#allocation2 + $0x139] sm:$0xff] %vm302_vm1, %v293_v12  ;;  %4740 = vmatpush3.bf16.msra.mxu0 %v4737_v42  ;;  %4211 = vmatprep.mubr.f32.mxu0 %v5706_v63  ;;  %v1994_v21 = vld [vmem:[#allocation6 + $0x2c0] sm:$0xff]  ;;  %v294_v22 = vld [vmem:[%s5568_s26 + $0xc8] sm:$0xff]  ;;  %6614 = vst [vmem:[#allocation27_spill] sm:$0xff] %v5729_v24  ;;  %v4617_v38 = vpack.c.bf16 %v396_v17, %v395_v13  ;;  %v5749_v41 = vsel %vm453_vm0, %v475_v2, %v477_v20 }
  0x89   : > { %4742 = vmatprep.subr.bf16.mxu0 %v4741_v61  ;;  %v5733_v31 = vld [vmem:[#allocation2 + $0x88] sm:$0x3]  ;;  %328 = vst.msk [vmem:[#allocation2 + $0x141] sm:$0xff] %vm302_vm1, %v294_v22  ;;  %4614 = vmatprep.subr.bf16.mxu1 %v4613_v11  ;;  %v1995_v34 = vld [vmem:[#allocation6 + $0x2c8] sm:$0xff]  ;;  %v5739_v35 = vld [vmem:[#allocation2 + $0x90] sm:$0xff]  ;;  %v5754_v43 = vsel %vm453_vm0, %v479_v27, %v480_v28 }
  0x8a   : > { %v5741_v37 = vld [vmem:[#allocation2 + $0x98] sm:$0xff]  ;;  %329 = vst.msk [vmem:[#allocation2 + $0x151] sm:$0xff] %vm302_vm1, %v295_v32  ;;  %330 = vst.msk [vmem:[#allocation2 + $0x159] sm:$0xff] %vm302_vm1, %v296_v33  ;;  %3894 = vmatprep.mubr.f32.mxu1 %v5706_v63  ;;  %v397_v39 = vld [vmem:[#allocation6 + $0x40] sm:$0xff]  ;;  %v482_v42 = vrot.slane %v5733_v31, 1  ;;  %v4749_v45 = vpack.c.bf16 %v1995_v34, %v1994_v21  ;;  %4616 = vmatpush3.bf16.msra.mxu1 %v4613_v11  ;;  %v484_v46 = vrot.slane %v5739_v35, 1 }
  0x8b   : > { %4212 = vmatmul.mubr.f32.gmra.mrb[4].mxu0 %v5724_v18  ;;  %v398_v40 = vld [vmem:[#allocation6 + $0x48] sm:$0xff]  ;;  %6615 = vst [vmem:[#allocation28_spill] sm:$0xff] %v5749_v41  ;;  %v297_v1 = vld [vmem:[%s5568_s26 + $0xe0] sm:$0xff]  ;;  %6616 = vst [vmem:[#allocation29_spill] sm:$0xff] %v5754_v43  ;;  %v485_v50 = vrot.slane %v5741_v37, 1  ;;  %3895 = vmatmul.mubr.f32.gmra.mrb[6].mxu1 %v5724_v18 }
  0x8c   : > { %4744 = vmatpush3.bf16.msra.mxu0 %v4741_v61  ;;  %4214 = vmatprep.mubr.f32.mxu0 %v5729_v24  ;;  %v5758_v54 = vld [vmem:[#allocation2 + $0xa0] sm:$0x3]  ;;  %v298_v56 = vld [vmem:[%s5568_s26 + $0xe8] sm:$0xff]  ;;  %331 = vst.msk [vmem:[#allocation2 + $0x169] sm:$0xff] %vm302_vm1, %v297_v1  ;;  %v1997_v57 = vld [vmem:[#allocation6 + $0x2d8] sm:$0xff]  ;;  %v4621_v61 = vpack.c.bf16 %v398_v40, %v397_v39  ;;  %v5772_v4 = vsel %vm453_vm0, %v480_v28, %v482_v42 }
  0x8d   : > { %4746 = vmatprep.subr.bf16.mxu0 %v4745_v26  ;;  %v1996_v55 = vld [vmem:[#allocation6 + $0x2d0] sm:$0xff]  ;;  %v5763_v60 = vld [vmem:[#allocation2 + $0xa8] sm:$0xff]  ;;  %v5765_v62 = vld [vmem:[#allocation2 + $0xb0] sm:$0xff]  ;;  %4618 = vmatprep.subr.bf16.mxu1 %v4617_v38  ;;  %332 = vst.msk [vmem:[#allocation2 + $0x171] sm:$0xff] %vm302_vm1, %v298_v56  ;;  %v487_v6 = vrot.slane %v5758_v54, 1  ;;  %v5776_v11 = vsel %vm453_vm0, %v484_v46, %v485_v50 }
  0x8e   : > { %3897 = vmatprep.mubr.f32.mxu1 %v5729_v24  ;;  %v399_v0 = vld [vmem:[#allocation6 + $0x50] sm:$0xff]  ;;  %v400_v2 = vld [vmem:[#allocation6 + $0x58] sm:$0xff]  ;;  %6617 = vst [vmem:[#allocation30_spill] sm:$0xff] %v5772_v4  ;;  %6618 = vst [vmem:[#allocation31_spill] sm:$0xff] %v5776_v11  ;;  %v4753_v12 = vpack.c.bf16 %v1997_v57, %v1996_v55  ;;  %v489_v13 = vrot.slane %v5763_v60, 1  ;;  %v490_v17 = vrot.slane %v5765_v62, 1  ;;  %4620 = vmatpush3.bf16.msra.mxu1 %v4617_v38 }
  0x8f   : > { %4215 = vmatmul.mubr.f32.gmra.mrb[6].mxu0 %v5749_v41  ;;  %v5780_v20 = vld [vmem:[#allocation2 + $0xb8] sm:$0x3]  ;;  %v1998_v21 = vld [vmem:[#allocation6 + $0x2e0] sm:$0xff]  ;;  %3898 = vmatmul.mubr.f32.gmra.mrb[8].mxu1 %v5749_v41  ;;  %v5785_v27 = vld [vmem:[#allocation2 + $0xc8] sm:$0xff]  ;;  %v4625_v28 = vpack.c.bf16 %v400_v2, %v399_v0  ;;  %v5791_v34 = vsel %vm453_vm0, %v485_v50, %v487_v6 }
  0x90   : > { %4748 = vmatpush3.bf16.msra.mxu0 %v4745_v26  ;;  %4217 = vmatprep.mubr.f32.mxu0 %v5754_v43  ;;  %v1999_v22 = vld [vmem:[#allocation6 + $0x2e8] sm:$0xff]  ;;  %v5783_v26 = vld [vmem:[#allocation2 + $0xc0] sm:$0xff]  ;;  %v401_v32 = vld [vmem:[#allocation6 + $0x60] sm:$0xff]  ;;  %6619 = vst [vmem:[#allocation32_spill] sm:$0xff] %v5791_v34  ;;  %v492_v38 = vrot.slane %v5780_v20, 1  ;;  %v5795_v39 = vsel %vm453_vm0, %v489_v13, %v490_v17  ;;  %v495_v1 = vrot.slane %v5785_v27, 1 }
  0x91   : > { %4750 = vmatprep.subr.bf16.mxu0 %v4749_v45  ;;  %4622 = vmatprep.subr.bf16.mxu1 %v4621_v61  ;;  %v402_v33 = vld [vmem:[#allocation6 + $0x68] sm:$0xff]  ;;  %6620 = vst [vmem:[#allocation33_spill] sm:$0xff] %v5795_v39  ;;  %v4757_v40 = vpack.c.bf16 %v1999_v22, %v1998_v21  ;;  %v494_v42 = vrot.slane %v5783_v26, 1  ;;  %v5799_v46 = vld [vmem:[#allocation2 + $0xd0] sm:$0x3]  ;;  %v2001_v50 = vld [vmem:[#allocation6 + $0x2f8] sm:$0xff] }
  0x92   : > { %3900 = vmatprep.mubr.f32.mxu1 %v5754_v43  ;;  %4624 = vmatpush3.bf16.msra.mxu1 %v4621_v61  ;;  %v4629_v55 = vpack.c.bf16 %v402_v33, %v401_v32  ;;  %v403_v56 = vld [vmem:[#allocation6 + $0x70] sm:$0xff]  ;;  %v404_v57 = vld [vmem:[#allocation6 + $0x78] sm:$0xff]  ;;  %v5808_v6 = vsel %vm453_vm0, %v490_v17, %v492_v38  ;;  %v497_v61 = vrot.slane %v5799_v46, 1  ;;  %v1039_v22 = vrot.slane %v5619_v49, 2  ;;  %v5818_v32 = vld [vmem:[#allocation2 + $0xd8] sm:$0xff] }
  0x93   : > { %4218 = vmatmul.mubr.f32.gmra.mrb[8].mxu0 %v5772_v4  ;;  %3901 = vmatmul.mubr.f32.gmra.mrb[10].mxu1 %v5772_v4  ;;  %v299_v0 = vld [vmem:[%s5568_s26 + $0xf0] sm:$0xff]  ;;  %v300_v2 = vld [vmem:[%s5568_s26 + $0xf8] sm:$0xff]  ;;  %6621 = vst [vmem:[#allocation34_spill] sm:$0xff] %v5808_v6  ;;  %v5814_v13 = vsel %vm453_vm0, %v494_v42, %v495_v1  ;;  %v2260_v17 = vld [vmem:[#allocation6 + $0x300] sm:$0xff]  ;;  %v1057_v43 = vrot.slane %v5710_v3, 2  ;;  %v1059_v3 = vrot.slane %v5713_v7, 2 }
  0x94   : > { %4752 = vmatpush3.bf16.msra.mxu0 %v4749_v45  ;;  %4220 = vmatprep.mubr.f32.mxu0 %v5776_v11  ;;  %v2000_v45 = vld [vmem:[#allocation6 + $0x2f0] sm:$0xff]  ;;  %333 = vst.msk [vmem:[#allocation2 + $0x181] sm:$0xff] %vm302_vm1, %v299_v0  ;;  %334 = vst.msk [vmem:[#allocation2 + $0x189] sm:$0xff] %vm302_vm1, %v300_v2  ;;  %v2261_v38 = vld [vmem:[#allocation6 + $0x308] sm:$0xff]  ;;  %v4633_v0 = vpack.c.bf16 %v404_v57, %v403_v56  ;;  %v499_v2 = vrot.slane %v5818_v32, 1 }
  0x95   : > { %4754 = vmatprep.subr.bf16.mxu0 %v4753_v12  ;;  %4626 = vmatprep.subr.bf16.mxu1 %v4625_v28  ;;  %6622 = vst [vmem:[#allocation35_spill] sm:$0xff] %v5814_v13  ;;  %v4761_v21 = vpack.c.bf16 %v2001_v50, %v2000_v45  ;;  %v5820_v33 = vld [vmem:[#allocation2 + $0xe0] sm:$0xff]  ;;  %v1147_v42 = vld [vmem:[#allocation6 + $0x100] sm:$0xff]  ;;  %v1148_v45 = vld [vmem:[#allocation6 + $0x108] sm:$0xff]  ;;  %v1042_v50 = vrot.slane %v5645_v8, 2  ;;  %v4765_v57 = vpack.c.bf16 %v2261_v38, %v2260_v17  ;;  %v1045_v8 = vrot.slane %v5651_v16, 2 }
  0x96   : > { %3903 = vmatprep.mubr.f32.mxu1 %v5776_v11  ;;  %4628 = vmatpush3.bf16.msra.mxu1 %v4625_v28  ;;  %v5828_v28 = vsel %vm453_vm0, %v495_v1, %v497_v61  ;;  %v500_v5 = vrot.slane %v5820_v33, 1  ;;  %v5832_v58 = vld [vmem:[#allocation2 + $0xe8] sm:$0x3]  ;;  %v5841_v36 = vld [vmem:[#allocation2 + $0xf8] sm:$0xff]  ;;  %v2262_v1 = vld [vmem:[#allocation6 + $0x310] sm:$0xff]  ;;  %v5844_v25 = vpack.c.bf16 %v1148_v45, %v1147_v42  ;;  %v1047_v17 = vrot.slane %v5659_v23, 2 }
  0x97   : > { %4221 = vmatmul.mubr.f32.gmra.mrb[10].mxu0 %v5791_v34  ;;  %3904 = vmatmul.mubr.f32.gmra.mrb[12].mxu1 %v5791_v34  ;;  %6623 = vst [vmem:[#allocation36_spill] sm:$0xff] %v5828_v28  ;;  %v2263_v61 = vld [vmem:[#allocation6 + $0x318] sm:$0xff]  ;;  %v505_v45 = vrot.slane %v5841_v36, 1  ;;  %v5859_v19 = vld [vmem:[#allocation2 + $0x100] sm:$0x3]  ;;  %v5862_v14 = vsel %vm1033_vm2, %v1044_v47, %v1045_v8  ;;  %v1049_v23 = vrot.slane %v5665_v29, 2 }
  0x98   : > { %4756 = vmatpush3.bf16.msra.mxu0 %v4753_v12  ;;  %4223 = vmatprep.mubr.f32.mxu0 %v5795_v39  ;;  %v1040_v12 = vrot.slane %v5623_v53, 2  ;;  %v5855_v38 = vsel %vm453_vm0, %v499_v2, %v500_v5  ;;  %v2264_v2 = vld [vmem:[#allocation6 + $0x320] sm:$0xff]  ;;  %v5888_v34 = vld [vmem:[#allocation2 + $0x118] sm:$0x3]  ;;  %v2267_v11 = vld [vmem:[#allocation6 + $0x338] sm:$0xff] }
  0x99   : > { %4758 = vmatprep.subr.bf16.mxu0 %v4757_v40  ;;  %4630 = vmatprep.subr.bf16.mxu1 %v4629_v55  ;;  %6624 = vst [vmem:[#allocation37_spill] sm:$0xff] %v5855_v38  ;;  %v512_v4 = vrot.slane %v5888_v34, 1  ;;  %v2269_v24 = vld [vmem:[#allocation6 + $0x348] sm:$0xff]  ;;  %v5944_v59 = vld [vmem:[#allocation2 + $0x148] sm:$0x3] }
  0x9a   : > { %3906 = vmatprep.mubr.f32.mxu1 %v5795_v39  ;;  %v5835_v56 = vsel %vm1033_vm2, %v1039_v22, %v1040_v12  ;;  %4632 = vmatpush3.bf16.msra.mxu1 %v4629_v55  ;;  %v502_v22 = vrot.slane %v5832_v58, 1  ;;  %v5852_v55 = vsel %vm1033_vm2, %v1040_v12, %v1042_v50  ;;  %v5866_v12 = vld [vmem:[#allocation2 + $0x108] sm:$0xff]  ;;  %v5868_v50 = vld [vmem:[#allocation2 + $0x110] sm:$0xff]  ;;  %v522_v48 = vrot.slane %v5944_v59, 1 }
  0x9b   : > { %4224 = vmatmul.mubr.f32.gmra.mrb[12].mxu0 %v5808_v6  ;;  %3907 = vmatmul.mubr.f32.gmra.mrb[14].mxu1 %v5808_v6  ;;  %v2265_v6 = vld [vmem:[#allocation6 + $0x328] sm:$0xff]  ;;  %v509_v39 = vrot.slane %v5866_v12, 1 }
  0x9c   : > { %4760 = vmatpush3.bf16.msra.mxu0 %v4757_v40  ;;  %4226 = vmatprep.mubr.f32.mxu0 %v5814_v13  ;;  %v5839_v40 = vld [vmem:[#allocation2 + $0xf0] sm:$0xff]  ;;  %v5875_v47 = vsel %vm453_vm0, %v500_v5, %v502_v22  ;;  %v5895_v22 = vld [vmem:[#allocation2 + $0x120] sm:$0xff] }
  0x9d   : > { %4762 = vmatprep.subr.bf16.mxu0 %v4761_v21  ;;  %4634 = vmatprep.subr.bf16.mxu1 %v4633_v0  ;;  %v504_v42 = vrot.slane %v5839_v40, 1  ;;  %6625 = vst [vmem:[#allocation38_spill] sm:$0xff] %v5875_v47 }
  0x9e   : > { %3909 = vmatprep.mubr.f32.mxu1 %v5814_v13  ;;  %v4769_v13 = vpack.c.bf16 %v2263_v61, %v2262_v1  ;;  %4636 = vmatpush3.bf16.msra.mxu1 %v4633_v0  ;;  %v5878_v1 = vsel %vm1033_vm2, %v1045_v8, %v1047_v17  ;;  %v507_v61 = vrot.slane %v5859_v19, 1  ;;  %v1054_v8 = vrot.slane %v5689_v51, 2  ;;  %v5897_v17 = vld [vmem:[#allocation2 + $0x128] sm:$0xff] }
  0x9f   : > { %4227 = vmatmul.mubr.f32.gmra.mrb[14].mxu0 %v5828_v28  ;;  %3910 = vmatmul.mubr.f32.gmra.mrb[16].mxu1 %v5828_v28  ;;  %v5883_v0 = vsel %vm453_vm0, %v504_v42, %v505_v45  ;;  %v1052_v28 = vrot.slane %v5682_v44, 2  ;;  %v4773_v42 = vpack.c.bf16 %v2265_v6, %v2264_v2  ;;  %v2266_v44 = vld [vmem:[#allocation6 + $0x330] sm:$0xff]  ;;  %v514_v2 = vrot.slane %v5895_v22, 1 }
  0xa0   : > { %4764 = vmatpush3.bf16.msra.mxu0 %v4761_v21  ;;  %4285 = vmatprep.mubr.f32.mxu0 %v5835_v56  ;;  %v1050_v21 = vrot.slane %v5667_v30, 2  ;;  %6626 = vst [vmem:[#allocation39_spill] sm:$0xff] %v5883_v0 }
  0xa1   : > { %4766 = vmatprep.subr.bf16.mxu0 %v4765_v57  ;;  %4638 = vmatprep.subr.bf16.mxu1 %v5844_v25 }
  0xa2   : > { %3912 = vmatprep.mubr.f32.mxu1 %v5855_v38  ;;  %v510_v38 = vrot.slane %v5868_v50, 1  ;;  %v5891_v5 = vsel %vm1033_vm2, %v1049_v23, %v1050_v21  ;;  %v5903_v23 = vsel %vm453_vm0, %v505_v45, %v507_v61  ;;  %v5909_v41 = vsel %vm1033_vm2, %v1050_v21, %v1052_v28  ;;  %v5923_v28 = vld [vmem:[#allocation2 + $0x138] sm:$0xff]  ;;  %v2268_v21 = vld [vmem:[#allocation6 + $0x340] sm:$0xff] }
  0xa3   : > { %4286 = vmatmul.mubr.f32.vlgmr.msra.gmra.mrb[0].mxu0 %v5852_v55  ;;  %6627 = vst [vmem:[#allocation40_spill] sm:$0xff] %v5891_v5  ;;  %3913 = vmatmul.mubr.f32.gmra.mrb[18].mxu1 %v5875_v47  ;;  %6628 = vst [vmem:[#allocation41_spill] sm:$0xff] %v5903_v23  ;;  %v5916_v47 = vld [vmem:[#allocation2 + $0x130] sm:$0x3]  ;;  %v1060_v61 = vrot.slane %v5715_v10, 2 }
  0xa4   : > { %4768 = vmatpush3.bf16.msra.mxu0 %v4765_v57  ;;  %4288 = vmatprep.mubr.f32.mxu0 %v5862_v14  ;;  %v1055_v57 = vrot.slane %v5691_v52, 2  ;;  %6629 = vst [vmem:[#allocation42_spill] sm:$0xff] %v5909_v41  ;;  %v5912_v6 = vsel %vm453_vm0, %v509_v39, %v510_v38  ;;  %v4777_v39 = vpack.c.bf16 %v2267_v11, %v2266_v44  ;;  %v517_v63 = vrot.slane %v5916_v47, 1 }
  0xa5   : > { %4770 = vmatprep.subr.bf16.mxu0 %v4769_v13  ;;  %3915 = vmatprep.mubr.f32.mxu1 %v5883_v0  ;;  %6630 = vst [vmem:[#allocation43_spill] sm:$0xff] %v5912_v6  ;;  %v515_v0 = vrot.slane %v5897_v17, 1  ;;  %v1062_v44 = vrot.slane %v5733_v31, 2  ;;  %v4781_v31 = vpack.c.bf16 %v2269_v24, %v2268_v21 }
  0xa6   : > { %v5919_v45 = vsel %vm1033_vm2, %v1054_v8, %v1055_v57  ;;  %v5931_v8 = vsel %vm453_vm0, %v510_v38, %v512_v4  ;;  %v5934_v18 = vsel %vm1033_vm2, %v1055_v57, %v1057_v43  ;;  %v5947_v4 = vsel %vm1033_vm2, %v1059_v3, %v1060_v61  ;;  %v5951_v57 = vld [vmem:[#allocation2 + $0x150] sm:$0xff] }
  0xa7   : > { %4289 = vmatmul.mubr.f32.gmra.mrb[2].mxu0 %v5878_v1  ;;  %6631 = vst [vmem:[#allocation44_spill] sm:$0xff] %v5919_v45  ;;  %3916 = vmatmul.mubr.f32.gmra.mrb[20].mxu1 %v5903_v23  ;;  %6632 = vst [vmem:[#allocation45_spill] sm:$0xff] %v5931_v8  ;;  %v5939_v11 = vsel %vm453_vm0, %v514_v2, %v515_v0  ;;  %v519_v23 = vrot.slane %v5923_v28, 1  ;;  %v1064_v43 = vrot.slane %v5739_v35, 2  ;;  %v1065_v38 = vrot.slane %v5741_v37, 2  ;;  %v5953_v2 = vld [vmem:[#allocation2 + $0x158] sm:$0xff] }
  0xa8   : > { %4291 = vmatprep.mubr.f32.mxu0 %v5891_v5  ;;  %4772 = vmatpush3.bf16.msra.mxu0 %v4769_v13  ;;  %v5925_v13 = vld [vmem:[#allocation2 + $0x140] sm:$0xff]  ;;  %6633 = vst [vmem:[#allocation46_spill] sm:$0xff] %v5934_v18  ;;  %6634 = vst [vmem:[#allocation47_spill] sm:$0xff] %v5939_v11  ;;  %v5959_v3 = vsel %vm453_vm0, %v515_v0, %v517_v63  ;;  %v524_v21 = vrot.slane %v5951_v57, 1  ;;  %v1070_v0 = vrot.slane %v5765_v62, 2 }
  0xa9   : > { %4774 = vmatprep.subr.bf16.mxu0 %v4773_v42  ;;  %3918 = vmatprep.mubr.f32.mxu1 %v5912_v6  ;;  %v520_v6 = vrot.slane %v5925_v13, 1  ;;  %6635 = vst [vmem:[#allocation48_spill] sm:$0xff] %v5947_v4  ;;  %6636 = vst [vmem:[#allocation49_spill] sm:$0xff] %v5959_v3  ;;  %v5975_v63 = vsel %vm1033_vm2, %v1064_v43, %v1065_v38 }
  0xaa   : > { %6639 = vst [vmem:[#allocation52_spill] sm:$0xff] %v5975_v63 }
  0xab   : > { %4292 = vmatmul.mubr.f32.gmra.mrb[4].mxu0 %v5909_v41  ;;  %3919 = vmatmul.mubr.f32.gmra.mrb[22].mxu1 %v5931_v8  ;;  %v5965_v41 = vsel %vm1033_vm2, %v1060_v61, %v1062_v44  ;;  %v5968_v24 = vsel %vm453_vm0, %v519_v23, %v520_v6  ;;  %v525_v8 = vrot.slane %v5953_v2, 1  ;;  %v5981_v61 = vld [vmem:[#allocation2 + $0x170] sm:$0xff] }
  0xac   : > { %4294 = vmatprep.mubr.f32.mxu0 %v5919_v45  ;;  %4776 = vmatpush3.bf16.msra.mxu0 %v4773_v42  ;;  %v2270_v42 = vld [vmem:[#allocation6 + $0x350] sm:$0xff]  ;;  %v1067_v45 = vrot.slane %v5758_v54, 2  ;;  %6637 = vst [vmem:[#allocation50_spill] sm:$0xff] %v5965_v41  ;;  %6638 = vst [vmem:[#allocation51_spill] sm:$0xff] %v5968_v24  ;;  %v1069_v54 = vrot.slane %v5763_v60, 2  ;;  %v2272_v44 = vld [vmem:[#allocation6 + $0x360] sm:$0xff] }
  0xad   : > { %4778 = vmatprep.subr.bf16.mxu0 %v4777_v39  ;;  %3921 = vmatprep.mubr.f32.mxu1 %v5939_v11  ;;  %v5972_v11 = vld [vmem:[#allocation2 + $0x160] sm:$0x3]  ;;  %v4785_v23 = vpack.c.bf16 %v2271_v9, %v2270_v42  ;;  %v5995_v9 = vsel %vm453_vm0, %v524_v21, %v525_v8  ;;  %v1072_v42 = vrot.slane %v5780_v20, 2  ;;  %v2275_v20 = vld [vmem:[#allocation6 + $0x378] sm:$0xff] }
  0xae   : > { %v5990_v43 = vsel %vm1033_vm2, %v1065_v38, %v1067_v45  ;;  %v527_v5 = vrot.slane %v5972_v11, 1  ;;  %6641 = vst [vmem:[#allocation54_spill] sm:$0xff] %v5995_v9  ;;  %v1075_v45 = vrot.slane %v5785_v27, 2  ;;  %v2274_v21 = vld [vmem:[#allocation6 + $0x370] sm:$0xff] }
  0xaf   : > { %4295 = vmatmul.mubr.f32.gmra.mrb[6].mxu0 %v5934_v18  ;;  %3922 = vmatmul.mubr.f32.gmra.mrb[24].mxu1 %v5959_v3  ;;  %v2273_v18 = vld [vmem:[#allocation6 + $0x368] sm:$0xff] }
  0xb0   : > { %4297 = vmatprep.mubr.f32.mxu0 %v5947_v4  ;;  %4780 = vmatpush3.bf16.msra.mxu0 %v4777_v39  ;;  %v5979_v4 = vld [vmem:[#allocation2 + $0x168] sm:$0xff]  ;;  %v5987_v39 = vsel %vm453_vm0, %v520_v6, %v522_v48  ;;  %v6003_v48 = vsel %vm1033_vm2, %v1069_v54, %v1070_v0  ;;  %v1074_v6 = vrot.slane %v5783_v26, 2  ;;  %v4789_v38 = vpack.c.bf16 %v2273_v18, %v2272_v44 }
  0xb1   : > { %4782 = vmatprep.subr.bf16.mxu0 %v4781_v31  ;;  %3924 = vmatprep.mubr.f32.mxu1 %v5968_v24  ;;  %6640 = vst [vmem:[#allocation53_spill] sm:$0xff] %v5987_v39  ;;  %v529_v3 = vrot.slane %v5979_v4, 1  ;;  %v6000_v24 = vld [vmem:[#allocation2 + $0x178] sm:$0x3]  ;;  %6642 = vst [vmem:[#allocation55_spill] sm:$0xff] %v6003_v48  ;;  %v6016_v54 = vsel %vm1033_vm2, %v1070_v0, %v1072_v42  ;;  %v1077_v44 = vrot.slane %v5799_v46, 2 }
  0xb2   : > { %v2545_v0 = vld [vmem:[#allocation6 + $0x388] sm:$0xff] }
  0xb3   : > { %4298 = vmatmul.mubr.f32.gmra.mrb[8].mxu0 %v5965_v41  ;;  %v530_v41 = vrot.slane %v5981_v61, 1  ;;  %3925 = vmatmul.mubr.f32.gmra.mrb[26].mxu1 %v5987_v39  ;;  %v6023_v39 = vsel %vm1033_vm2, %v1074_v6, %v1075_v45  ;;  %v1084_v6 = vrot.slane %v5839_v40, 2 }
  0xb4   : > { %4300 = vmatprep.mubr.f32.mxu0 %v5975_v63  ;;  %4784 = vmatpush3.bf16.msra.mxu0 %v4781_v31  ;;  %v6011_v63 = vsel %vm453_vm0, %v525_v8, %v527_v5  ;;  %v532_v31 = vrot.slane %v6000_v24, 1  ;;  %v1080_v5 = vrot.slane %v5820_v33, 2  ;;  %v4793_v8 = vpack.c.bf16 %v2275_v20, %v2274_v21 }
  0xb5   : > { %4786 = vmatprep.subr.bf16.mxu0 %v4785_v23  ;;  %3927 = vmatprep.mubr.f32.mxu1 %v5995_v9  ;;  %6643 = vst [vmem:[#allocation56_spill] sm:$0xff] %v6011_v63  ;;  %v6019_v18 = vsel %vm453_vm0, %v529_v3, %v530_v41  ;;  %v1079_v9 = vrot.slane %v5818_v32, 2  ;;  %v6035_v3 = vsel %vm1033_vm2, %v1075_v45, %v1077_v44  ;;  %v1085_v21 = vrot.slane %v5841_v36, 2  ;;  %v6047_v45 = vld [vmem:[#allocation2] sm:$0xff] }
  0xb6   : > { %6644 = vst [vmem:[#allocation57_spill] sm:$0xff] %v6019_v18  ;;  %v6031_v46 = vsel %vm453_vm0, %v530_v41, %v532_v31  ;;  %v1149_v41 = vld [vmem:[#allocation6 + $0x110] sm:$0xff]  ;;  %v1150_v31 = vld [vmem:[#allocation6 + $0x118] sm:$0xff]  ;;  %v1090_v44 = vrot.slane %v5868_v50, 2 }
  0xb7   : > { %4301 = vmatmul.mubr.f32.gmra.mrb[10].mxu0 %v5990_v43  ;;  %3928 = vmatmul.mubr.f32.gmra.mrb[28].mxu1 %v6011_v63  ;;  %6645 = vst [vmem:[#allocation58_spill] sm:$0xff] %v6031_v46  ;;  %v6039_v42 = vsel %vm1033_vm2, %v1079_v9, %v1080_v5  ;;  %v1087_v9 = vrot.slane %v5859_v19, 2  ;;  %v1158_v63 = vld [vmem:[#allocation6 + $0x158] sm:$0xff] }
  0xb8   : > { %4303 = vmatprep.mubr.f32.mxu0 %v6003_v48  ;;  %4788 = vmatpush3.bf16.msra.mxu0 %v4785_v23  ;;  %v2544_v48 = vld [vmem:[#allocation6 + $0x380] sm:$0xff]  ;;  %v1082_v23 = vrot.slane %v5832_v58, 2 }
  0xb9   : > { %4790 = vmatprep.subr.bf16.mxu0 %v4789_v38  ;;  %3930 = vmatprep.mubr.f32.mxu1 %v6019_v18  ;;  %v6043_v20 = vpack.c.bf16 %v2545_v0, %v2544_v48  ;;  %v6056_v48 = vsel %vm1033_vm2, %v1084_v6, %v1085_v21  ;;  %v4641_v0 = vpack.c.bf16 %v1150_v31, %v1149_v41  ;;  %v1152_v18 = vld [vmem:[#allocation6 + $0x128] sm:$0xff]  ;;  %v1095_v6 = vrot.slane %v5897_v17, 2 }
  0xba   : > { %v6052_v58 = vsel %vm1033_vm2, %v1080_v5, %v1082_v23  ;;  %v6067_v19 = vsel %vm1033_vm2, %v1085_v21, %v1087_v9  ;;  %v1092_v5 = vrot.slane %v5888_v34, 2  ;;  %v1094_v23 = vrot.slane %v5895_v22, 2  ;;  %v1155_v9 = vld [vmem:[#allocation6 + $0x140] sm:$0xff] }
  0xbb   : > { %4304 = vmatmul.mubr.f32.gmra.mrb[12].mxu0 %v6016_v54  ;;  %3931 = vmatmul.mubr.f32.gmra.mrb[30].mxu1 %v6031_v46  ;;  %v1151_v46 = vld [vmem:[#allocation6 + $0x120] sm:$0xff]  ;;  %v1097_v21 = vrot.slane %v5916_v47, 2 }
  0xbc   : > { %4306 = vmatprep.mubr.f32.mxu0 %v6023_v39  ;;  %4792 = vmatpush3.bf16.msra.mxu0 %v4789_v38  ;;  %v1089_v38 = vrot.slane %v5866_v12, 2  ;;  %v4645_v41 = vpack.c.bf16 %v1152_v18, %v1151_v46  ;;  %v6080_v34 = vsel %vm1033_vm2, %v1090_v44, %v1092_v5  ;;  %v6084_v31 = vsel %vm1033_vm2, %v1094_v23, %v1095_v6 }
  0xbd   : > { %4794 = vmatprep.subr.bf16.mxu0 %v4793_v8  ;;  %3965 = vmatprep.mubr.f32.mxu1 %v6047_v45  ;;  %6646 = vst [vmem:[#allocation59_spill] sm:$0xff] %v6084_v31  ;;  %v1099_v18 = vrot.slane %v5923_v28, 2  ;;  %v6093_v47 = vsel %vm1033_vm2, %v1095_v6, %v1097_v21  ;;  %v1104_v5 = vrot.slane %v5951_v57, 2  ;;  %v1105_v23 = vrot.slane %v5953_v2, 2 }
  0xbe   : > { %6647 = vst [vmem:[#allocation60_spill] sm:$0xff] %v6093_v47  ;;  %v1107_v6 = vrot.slane %v5972_v11, 2  ;;  %v1109_v21 = vrot.slane %v5979_v4, 2 }
  0xbf   : > { %4307 = vmatmul.mubr.f32.gmra.mrb[14].mxu0 %v6035_v3  ;;  %3966 = vmatmul.mubr.f32.vlgmr.msra.gmra.mrb[0].mxu1 %v6047_v45 }
  0xc0   : > { %4309 = vmatprep.mubr.f32.mxu0 %v6039_v42  ;;  %4796 = vmatpush3.bf16.msra.mxu0 %v4793_v8  ;;  %v6071_v8 = vsel %vm1033_vm2, %v1089_v38, %v1090_v44  ;;  %v1156_v38 = vld [vmem:[#allocation6 + $0x148] sm:$0xff]  ;;  %v1102_v44 = vrot.slane %v5944_v59, 2  ;;  %v6123_v11 = vsel %vm1033_vm2, %v1105_v23, %v1107_v6 }
  0xc1   : > { %4798 = vmatprep.subr.bf16.mxu0 %v6043_v20  ;;  %4640 = vmatpush3.bf16.msra.mxu1 %v5844_v25  ;;  %v1153_v25 = vld [vmem:[#allocation6 + $0x130] sm:$0xff] }
  0xc2   : > { %3968 = vmatprep.mubr.f32.mxu1 %v5619_v49  ;;  %4642 = vmatprep.subr.bf16.mxu1 %v4641_v0  ;;  %v1154_v49 = vld [vmem:[#allocation6 + $0x138] sm:$0xff] }
  0xc3   : > { %4310 = vmatmul.mubr.f32.gmra.mrb[16].mxu0 %v6052_v58  ;;  %3969 = vmatmul.mubr.f32.gmra.mrb[2].mxu1 %v5623_v53  ;;  %v1100_v53 = vrot.slane %v5925_v13, 2  ;;  %v4649_v46 = vpack.c.bf16 %v1154_v49, %v1153_v25  ;;  %v4653_v25 = vpack.c.bf16 %v1156_v38, %v1155_v9  ;;  %v1157_v49 = vld [vmem:[#allocation6 + $0x150] sm:$0xff]  ;;  %v1159_v38 = vld [vmem:[#allocation6 + $0x160] sm:$0xff] }
  0xc4   : > { %4312 = vmatprep.mubr.f32.mxu0 %v6056_v48  ;;  %3971 = vmatprep.mubr.f32.mxu1 %v5649_v15  ;;  %v4657_v9 = vpack.c.bf16 %v1158_v63, %v1157_v49  ;;  %v6131_v49 = vld [vmem:[#allocation2 + $0x190] sm:$0x3] }
  0xc5   : > { %4644 = vmatpush3.bf16.msra.mxu1 %v4641_v0  ;;  %v6097_v0 = vsel %vm1033_vm2, %v1099_v18, %v1100_v53  ;;  %v6106_v59 = vsel %vm1033_vm2, %v1100_v53, %v1102_v44  ;;  %v1110_v18 = vrot.slane %v5981_v61, 2  ;;  %v1160_v53 = vld [vmem:[#allocation6 + $0x168] sm:$0xff] }
  0xc6   : > { %4646 = vmatprep.subr.bf16.mxu1 %v4645_v41  ;;  %6648 = vst [vmem:[#allocation61_spill] sm:$0xff] %v6097_v0  ;;  %6649 = vst [vmem:[#allocation62_spill] sm:$0xff] %v6106_v59 }
  0xc7   : > { %4313 = vmatmul.mubr.f32.gmra.mrb[18].mxu0 %v6067_v19  ;;  %3972 = vmatmul.mubr.f32.gmra.mrb[4].mxu1 %v5651_v16  ;;  %v6127_v63 = vsel %vm1033_vm2, %v1109_v21, %v1110_v18  ;;  %v1421_v21 = vld [vmem:[#allocation6 + $0x180] sm:$0xff] }
  0xc8   : > { %4315 = vmatprep.mubr.f32.mxu0 %v6071_v8  ;;  %3974 = vmatprep.mubr.f32.mxu1 %v5665_v29 }
  0xc9   : > { %4648 = vmatpush3.bf16.msra.mxu1 %v4645_v41  ;;  %v6110_v41 = vsel %vm1033_vm2, %v1104_v5, %v1105_v23  ;;  %v1981_v23 = vrot.slane %v6131_v49, 2 }
  0xca   : > { %4650 = vmatprep.subr.bf16.mxu1 %v4649_v46  ;;  %6650 = vst [vmem:[#allocation63_spill] sm:$0xff] %v6110_v41 }
  0xcb   : > { %4316 = vmatmul.mubr.f32.gmra.mrb[20].mxu0 %v6080_v34  ;;  %3975 = vmatmul.mubr.f32.gmra.mrb[6].mxu1 %v5667_v30 }
  0xcc   : > { %4318 = vmatprep.mubr.f32.mxu0 %v6084_v31  ;;  %3977 = vmatprep.mubr.f32.mxu1 %v5689_v51  ;;  %v1162_v31 = vld [vmem:[#allocation6 + $0x178] sm:$0xff] }
  0xcd   : > { %4652 = vmatpush3.bf16.msra.mxu1 %v4649_v46  ;;  %v1112_v46 = vrot.slane %v6000_v24, 2 }
  0xce   : > { %4654 = vmatprep.subr.bf16.mxu1 %v4653_v25 }
  0xcf   : > { %4319 = vmatmul.mubr.f32.gmra.mrb[22].mxu0 %v6093_v47  ;;  %3978 = vmatmul.mubr.f32.gmra.mrb[8].mxu1 %v5691_v52  ;;  %v6115_v47 = vld [vmem:[#allocation2 + $0x180] sm:$0xff]  ;;  %v6138_v24 = vsel %vm1033_vm2, %v1110_v18, %v1112_v46  ;;  %v2549_v46 = vld [vmem:[#allocation6 + $0x3a8] sm:$0xff] }
  0xd0   : > { %4321 = vmatprep.mubr.f32.mxu0 %v6097_v0  ;;  %v6117_v0 = vld [vmem:[#allocation2 + $0x188] sm:$0xff]  ;;  %3980 = vmatprep.mubr.f32.mxu1 %v5713_v7  ;;  %v1978_v44 = vrot.slane %v6115_v47, 2 }
  0xd1   : > { %4656 = vmatpush3.bf16.msra.mxu1 %v4653_v25  ;;  %v1979_v5 = vrot.slane %v6117_v0, 2 }
  0xd2   : > { %4658 = vmatprep.subr.bf16.mxu1 %v4657_v9 }
  0xd3   : > { %4322 = vmatmul.mubr.f32.gmra.mrb[24].mxu0 %v6106_v59  ;;  %v4661_v59 = vpack.c.bf16 %v1160_v53, %v1159_v38  ;;  %3981 = vmatmul.mubr.f32.gmra.mrb[10].mxu1 %v5715_v10  ;;  %v6142_v25 = vsel %vm1033_vm2, %v1978_v44, %v1979_v5  ;;  %v1422_v38 = vld [vmem:[#allocation6 + $0x188] sm:$0xff]  ;;  %v6149_v18 = vsel %vm1033_vm2, %v1979_v5, %v1981_v23  ;;  %v2551_v5 = vld [vmem:[#allocation6 + $0x3b8] sm:$0xff] }
  0xd4   : > { %4324 = vmatprep.mubr.f32.mxu0 %v6110_v41  ;;  %v1161_v41 = vld [vmem:[#allocation6 + $0x170] sm:$0xff]  ;;  %3983 = vmatprep.mubr.f32.mxu1 %v5739_v35  ;;  %v2553_v23 = vld [vmem:[#allocation6 + $0x3c8] sm:$0xff] }
  0xd5   : > { %4660 = vmatpush3.bf16.msra.mxu1 %v4657_v9  ;;  %v4665_v6 = vpack.c.bf16 %v1162_v31, %v1161_v41  ;;  %v6151_v9 = vpack.c.bf16 %v1422_v38, %v1421_v21  ;;  %v2546_v31 = vld [vmem:[#allocation6 + $0x390] sm:$0xff]  ;;  %v2547_v41 = vld [vmem:[#allocation6 + $0x398] sm:$0xff]  ;;  %v6184_v38 = vrot.slane %v6047_v45, 2 }
  0xd6   : > { %4662 = vmatprep.subr.bf16.mxu1 %v4661_v59  ;;  %v4801_v53 = vpack.c.bf16 %v2547_v41, %v2546_v31  ;;  %v2558_v21 = vld [vmem:[#allocation6 + $0x3f0] sm:$0xff]  ;;  %v2826_v31 = vld [vmem:[#allocation6 + $0x408] sm:$0xff]  ;;  %v5201_v41 = vld [vmem:[#allocation2 + $0x10] sm:$0x3] }
  0xd7   : > { %4325 = vmatmul.mubr.f32.gmra.mrb[26].mxu0 %v6123_v11  ;;  %3984 = vmatmul.mubr.f32.gmra.mrb[12].mxu1 %v5741_v37  ;;  %6651 = vst [vmem:[#allocation64_spill] sm:$0xff] %v6184_v38 }
  0xd8   : > { %4327 = vmatprep.mubr.f32.mxu0 %v6127_v63  ;;  %3986 = vmatprep.mubr.f32.mxu1 %v5763_v60 }
  0xd9   : > { %4664 = vmatpush3.bf16.msra.mxu1 %v4661_v59  ;;  %v2548_v59 = vld [vmem:[#allocation6 + $0x3a0] sm:$0xff] }
  0xda   : > { %4666 = vmatprep.subr.bf16.mxu1 %v4665_v6  ;;  %v4805_v44 = vpack.c.bf16 %v2549_v46, %v2548_v59  ;;  %v1424_v59 = vld [vmem:[#allocation6 + $0x198] sm:$0xff] }
  0xdb   : > { %4328 = vmatmul.mubr.f32.gmra.mrb[28].mxu0 %v6138_v24  ;;  %3987 = vmatmul.mubr.f32.gmra.mrb[14].mxu1 %v5765_v62 }
  0xdc   : > { %4330 = vmatprep.mubr.f32.mxu0 %v6142_v25  ;;  %3989 = vmatprep.mubr.f32.mxu1 %v5783_v26 }
  0xdd   : > { %4668 = vmatpush3.bf16.msra.mxu1 %v4665_v6  ;;  %v2556_v6 = vld [vmem:[#allocation6 + $0x3e0] sm:$0xff] }
  0xde   : > { %4670 = vmatprep.subr.bf16.mxu1 %v6151_v9 }
  0xdf   : > { %4331 = vmatmul.mubr.f32.gmra.mrb[30].mxu0 %v6149_v18  ;;  %3990 = vmatmul.mubr.f32.gmra.mrb[16].mxu1 %v5785_v27 }
  0xe0   : > { %4365 = vmatprep.mubr.f32.mxu0 %v5649_v15  ;;  %3992 = vmatprep.mubr.f32.mxu1 %v5818_v32  ;;  %v2550_v15 = vld [vmem:[#allocation6 + $0x3b0] sm:$0xff] }
  0xe3   : > { %4366 = vmatmul.mubr.f32.vlgmr.msra.gmra.mrb[0].mxu0 %v5651_v16  ;;  %3993 = vmatmul.mubr.f32.gmra.mrb[18].mxu1 %v5820_v33  ;;  %v4809_v16 = vpack.c.bf16 %v2551_v5, %v2550_v15  ;;  %v1428_v15 = vld [vmem:[#allocation6 + $0x1b8] sm:$0xff]  ;;  %v1431_v5 = vld [vmem:[#allocation6 + $0x1d0] sm:$0xff] }
  0xe4   : > { %4800 = vmatpush3.bf16.msra.mxu0 %v6043_v20  ;;  %4368 = vmatprep.mubr.f32.mxu0 %v5665_v29  ;;  %v2552_v20 = vld [vmem:[#allocation6 + $0x3c0] sm:$0xff] }
  0xe5   : > { %4802 = vmatprep.subr.bf16.mxu0 %v4801_v53  ;;  %3995 = vmatprep.mubr.f32.mxu1 %v5839_v40  ;;  %v4813_v29 = vpack.c.bf16 %v2553_v23, %v2552_v20  ;;  %v6655_v20 = vld [vmem:[#allocation46_spill] sm:$0xff]  ;;  %v1433_v23 = vld [vmem:[#allocation6 + $0x1e0] sm:$0xff] }
  0xe7   : > { %4369 = vmatmul.mubr.f32.gmra.mrb[2].mxu0 %v5667_v30  ;;  %3996 = vmatmul.mubr.f32.gmra.mrb[20].mxu1 %v5841_v36  ;;  %v2554_v30 = vld [vmem:[#allocation6 + $0x3d0] sm:$0xff] }
  0xe8   : > { %4371 = vmatprep.mubr.f32.mxu0 %v5689_v51  ;;  %4804 = vmatpush3.bf16.msra.mxu0 %v4801_v53  ;;  %v2555_v51 = vld [vmem:[#allocation6 + $0x3d8] sm:$0xff]  ;;  %v1037_v53 = vrot.slane %v5201_v41, 2 }
  0xe9   : > { %4806 = vmatprep.subr.bf16.mxu0 %v4805_v44  ;;  %3998 = vmatprep.mubr.f32.mxu1 %v5866_v12 }
  0xea   : > { %v1038_v46 = vsel %vm1033_vm2, %v6184_v38, %v1037_v53  ;;  %v6661_v53 = vld [vmem:[#allocation15_spill] sm:$0xff] }
  0xeb   : > { %4372 = vmatmul.mubr.f32.gmra.mrb[4].mxu0 %v5691_v52  ;;  %3999 = vmatmul.mubr.f32.gmra.mrb[22].mxu1 %v5868_v50  ;;  %v4817_v52 = vpack.c.bf16 %v2555_v51, %v2554_v30  ;;  %v6656_v30 = vld [vmem:[#allocation48_spill] sm:$0xff] }
  0xec   : > { %4374 = vmatprep.mubr.f32.mxu0 %v5713_v7  ;;  %4808 = vmatpush3.bf16.msra.mxu0 %v4805_v44  ;;  %v2557_v7 = vld [vmem:[#allocation6 + $0x3e8] sm:$0xff] }
  0xed   : > { %4810 = vmatprep.subr.bf16.mxu0 %v4809_v16  ;;  %4001 = vmatprep.mubr.f32.mxu1 %v5895_v22  ;;  %v1426_v44 = vld [vmem:[#allocation6 + $0x1a8] sm:$0xff] }
  0xef   : > { %4375 = vmatmul.mubr.f32.gmra.mrb[6].mxu0 %v5715_v10  ;;  %4002 = vmatmul.mubr.f32.gmra.mrb[24].mxu1 %v5897_v17  ;;  %v4821_v10 = vpack.c.bf16 %v2557_v7, %v2556_v6  ;;  %v1435_v6 = vld [vmem:[#allocation6 + $0x1f0] sm:$0xff]  ;;  %v1436_v7 = vld [vmem:[#allocation6 + $0x1f8] sm:$0xff] }
  0xf0   : > { %4377 = vmatprep.mubr.f32.mxu0 %v5739_v35  ;;  %4812 = vmatpush3.bf16.msra.mxu0 %v4809_v16  ;;  %v2559_v35 = vld [vmem:[#allocation6 + $0x3f8] sm:$0xff] }
  0xf1   : > { %4814 = vmatprep.subr.bf16.mxu0 %v4813_v29  ;;  %4004 = vmatprep.mubr.f32.mxu1 %v5923_v28  ;;  %v6654_v16 = vld [vmem:[#allocation44_spill] sm:$0xff] }
  0xf3   : > { %4378 = vmatmul.mubr.f32.gmra.mrb[8].mxu0 %v5741_v37  ;;  %4005 = vmatmul.mubr.f32.gmra.mrb[26].mxu1 %v5925_v13  ;;  %v4825_v37 = vpack.c.bf16 %v2559_v35, %v2558_v21  ;;  %v4697_v21 = vpack.c.bf16 %v1436_v7, %v1435_v6  ;;  %v6659_v35 = vld [vmem:[#allocation55_spill] sm:$0xff]  ;;  %v6671_v7 = vld [vmem:[#allocation60_spill] sm:$0xff] }
  0xf4   : > { %4380 = vmatprep.mubr.f32.mxu0 %v5763_v60  ;;  %4816 = vmatpush3.bf16.msra.mxu0 %v4813_v29  ;;  %v2825_v60 = vld [vmem:[#allocation6 + $0x400] sm:$0xff]  ;;  %v1434_v29 = vld [vmem:[#allocation6 + $0x1e8] sm:$0xff] }
  0xf5   : > { %4818 = vmatprep.subr.bf16.mxu0 %v4817_v52  ;;  %4007 = vmatprep.mubr.f32.mxu1 %v5951_v57  ;;  %v4693_v51 = vpack.c.bf16 %v1434_v29, %v1433_v23  ;;  %v6668_v23 = vld [vmem:[#allocation30_spill] sm:$0xff]  ;;  %v6669_v29 = vld [vmem:[#allocation59_spill] sm:$0xff] }
  0xf7   : > { %4381 = vmatmul.mubr.f32.gmra.mrb[10].mxu0 %v5765_v62  ;;  %4008 = vmatmul.mubr.f32.gmra.mrb[28].mxu1 %v5953_v2  ;;  %v6190_v62 = vpack.c.bf16 %v2826_v31, %v2825_v60  ;;  %v2828_v60 = vld [vmem:[#allocation6 + $0x418] sm:$0xff]  ;;  %v6660_v31 = vld [vmem:[#allocation23_spill] sm:$0xff] }
  0xf8   : > { %4383 = vmatprep.mubr.f32.mxu0 %v5783_v26  ;;  %4820 = vmatpush3.bf16.msra.mxu0 %v4817_v52  ;;  %v1423_v26 = vld [vmem:[#allocation6 + $0x190] sm:$0xff]  ;;  %v6657_v52 = vld [vmem:[#allocation50_spill] sm:$0xff] }
  0xf9   : > { %4822 = vmatprep.subr.bf16.mxu0 %v4821_v10  ;;  %4010 = vmatprep.mubr.f32.mxu1 %v5979_v4 }
  0xfb   : > { %4384 = vmatmul.mubr.f32.gmra.mrb[12].mxu0 %v5785_v27  ;;  %4011 = vmatmul.mubr.f32.gmra.mrb[30].mxu1 %v5981_v61  ;;  %v4673_v27 = vpack.c.bf16 %v1424_v59, %v1423_v26  ;;  %v2829_v26 = vld [vmem:[#allocation6 + $0x420] sm:$0xff]  ;;  %v2830_v59 = vld [vmem:[#allocation6 + $0x428] sm:$0xff] }
  0xfc   : > { %4386 = vmatprep.mubr.f32.mxu0 %v5818_v32  ;;  %4824 = vmatpush3.bf16.msra.mxu0 %v4821_v10  ;;  %v1425_v32 = vld [vmem:[#allocation6 + $0x1a0] sm:$0xff]  ;;  %v6658_v10 = vld [vmem:[#allocation52_spill] sm:$0xff] }
  0xfd   : > { %4826 = vmatprep.subr.bf16.mxu0 %v4825_v37  ;;  %4045 = vmatprep.mubr.f32.mxu1 %v6184_v38  ;;  %v6699_v38 = vld [vmem:[#allocation58_spill] sm:$0xff] }
  0xff   : > { %4387 = vmatmul.mubr.f32.gmra.mrb[14].mxu0 %v5820_v33  ;;  %4046 = vmatmul.mubr.f32.vlgmr.msra.gmra.mrb[0].mxu1 %v1038_v46  ;;  %v4677_v33 = vpack.c.bf16 %v1426_v44, %v1425_v32  ;;  %v6662_v46 = vld [vmem:[#allocation24_spill] sm:$0xff]  ;;  %v4837_v32 = vpack.c.bf16 %v2830_v59, %v2829_v26  ;;  %v2831_v44 = vld [vmem:[#allocation6 + $0x430] sm:$0xff]  ;;  %v6675_v59 = vld [vmem:[#allocation62_spill] sm:$0xff] }
 0x100   : > { %4389 = vmatprep.mubr.f32.mxu0 %v5839_v40  ;;  %4828 = vmatpush3.bf16.msra.mxu0 %v4825_v37  ;;  %v1427_v40 = vld [vmem:[#allocation6 + $0x1b0] sm:$0xff] }
 0x101   : > { %4830 = vmatprep.subr.bf16.mxu0 %v6190_v62  ;;  %4672 = vmatpush3.bf16.msra.mxu1 %v6151_v9  ;;  %v1430_v9 = vld [vmem:[#allocation6 + $0x1c8] sm:$0xff]  ;;  %v2827_v37 = vld [vmem:[#allocation6 + $0x410] sm:$0xff] }
 0x102   : > { %4048 = vmatprep.mubr.f32.mxu1 %v5835_v56  ;;  %4674 = vmatprep.subr.bf16.mxu1 %v4673_v27  ;;  %v1429_v56 = vld [vmem:[#allocation6 + $0x1c0] sm:$0xff]  ;;  %v4833_v41 = vpack.c.bf16 %v2828_v60, %v2827_v37  ;;  %v2838_v37 = vld [vmem:[#allocation6 + $0x468] sm:$0xff]  ;;  %v6672_v60 = vld [vmem:[#allocation32_spill] sm:$0xff] }
 0x103   : > { %4390 = vmatmul.mubr.f32.gmra.mrb[16].mxu0 %v5841_v36  ;;  %4049 = vmatmul.mubr.f32.gmra.mrb[2].mxu1 %v5852_v55  ;;  %v4681_v36 = vpack.c.bf16 %v1428_v15, %v1427_v40  ;;  %v4685_v55 = vpack.c.bf16 %v1430_v9, %v1429_v56  ;;  %v6664_v40 = vld [vmem:[#allocation26_spill] sm:$0xff]  ;;  %v6665_v15 = vld [vmem:[#allocation27_spill] sm:$0xff]  ;;  %v6666_v9 = vld [vmem:[#allocation28_spill] sm:$0xff] }
 0x104   : > { %4392 = vmatprep.mubr.f32.mxu0 %v5866_v12  ;;  %4051 = vmatprep.mubr.f32.mxu1 %v5862_v14  ;;  %v6652_v12 = vld [vmem:[#allocation40_spill] sm:$0xff]  ;;  %v2834_v56 = vld [vmem:[#allocation6 + $0x448] sm:$0xff] }
 0x105   : > { %4676 = vmatpush3.bf16.msra.mxu1 %v4673_v27  ;;  %v6663_v27 = vld [vmem:[#allocation25_spill] sm:$0xff] }
 0x106   : > { %4678 = vmatprep.subr.bf16.mxu1 %v4677_v33 }
 0x107   : > { %4393 = vmatmul.mubr.f32.gmra.mrb[18].mxu0 %v5868_v50  ;;  %4052 = vmatmul.mubr.f32.gmra.mrb[4].mxu1 %v5878_v1  ;;  %v6653_v50 = vld [vmem:[#allocation42_spill] sm:$0xff] }
 0x108   : > { %4395 = vmatprep.mubr.f32.mxu0 %v5895_v22  ;;  %4054 = vmatprep.mubr.f32.mxu1 %v6652_v12  ;;  %v1432_v22 = vld [vmem:[#allocation6 + $0x1d8] sm:$0xff] }
 0x109   : > { %4680 = vmatpush3.bf16.msra.mxu1 %v4677_v33  ;;  %v2832_v33 = vld [vmem:[#allocation6 + $0x438] sm:$0xff] }
 0x10a   : > { %4682 = vmatprep.subr.bf16.mxu1 %v4681_v36 }
 0x10b   : > { %4396 = vmatmul.mubr.f32.gmra.mrb[20].mxu0 %v5897_v17  ;;  %4055 = vmatmul.mubr.f32.gmra.mrb[6].mxu1 %v6653_v50  ;;  %v4689_v17 = vpack.c.bf16 %v1432_v22, %v1431_v5  ;;  %v2835_v22 = vld [vmem:[#allocation6 + $0x450] sm:$0xff] }
 0x10c   : > { %4398 = vmatprep.mubr.f32.mxu0 %v5923_v28  ;;  %4057 = vmatprep.mubr.f32.mxu1 %v6654_v16 }
 0x10d   : > { %4684 = vmatpush3.bf16.msra.mxu1 %v4681_v36  ;;  %v4841_v36 = vpack.c.bf16 %v2832_v33, %v2831_v44  ;;  %v6677_v44 = vld [vmem:[#allocation63_spill] sm:$0xff] }
 0x10e   : > { %4686 = vmatprep.subr.bf16.mxu1 %v4685_v55  ;;  %v6678_v33 = vld [vmem:[#allocation35_spill] sm:$0xff] }
 0x10f   : > { %4399 = vmatmul.mubr.f32.gmra.mrb[22].mxu0 %v5925_v13  ;;  %4058 = vmatmul.mubr.f32.gmra.mrb[8].mxu1 %v6655_v20 }
 0x110   : > { %4401 = vmatprep.mubr.f32.mxu0 %v5951_v57  ;;  %4060 = vmatprep.mubr.f32.mxu1 %v6656_v30 }
 0x111   : > { %4688 = vmatpush3.bf16.msra.mxu1 %v4685_v55  ;;  %v6667_v55 = vld [vmem:[#allocation29_spill] sm:$0xff] }
 0x112   : > { %4690 = vmatprep.subr.bf16.mxu1 %v4689_v17 }
 0x113   : > { %4402 = vmatmul.mubr.f32.gmra.mrb[24].mxu0 %v5953_v2  ;;  %4061 = vmatmul.mubr.f32.gmra.mrb[10].mxu1 %v6657_v52 }
 0x114   : > { %4404 = vmatprep.mubr.f32.mxu0 %v5979_v4  ;;  %4063 = vmatprep.mubr.f32.mxu1 %v6658_v10 }
 0x115   : > { %4692 = vmatpush3.bf16.msra.mxu1 %v4689_v17  ;;  %v2836_v17 = vld [vmem:[#allocation6 + $0x458] sm:$0xff] }
 0x116   : > { %4694 = vmatprep.subr.bf16.mxu1 %v4693_v51  ;;  %v4849_v6 = vpack.c.bf16 %v2836_v17, %v2835_v22  ;;  %v5204_v22 = vld [vmem:[#allocation2 + $0x30] sm:$0xff]  ;;  %v6684_v17 = vld [vmem:[#allocation43_spill] sm:$0xff] }
 0x117   : > { %4405 = vmatmul.mubr.f32.gmra.mrb[26].mxu0 %v5981_v61  ;;  %4064 = vmatmul.mubr.f32.gmra.mrb[12].mxu1 %v5990_v43 }
 0x118   : > { %4407 = vmatprep.mubr.f32.mxu0 %v6115_v47  ;;  %4066 = vmatprep.mubr.f32.mxu1 %v6659_v35 }
 0x119   : > { %4696 = vmatpush3.bf16.msra.mxu1 %v4693_v51  ;;  %v6670_v51 = vld [vmem:[#allocation31_spill] sm:$0xff] }
 0x11a   : > { %4698 = vmatprep.subr.bf16.mxu1 %v4697_v21 }
 0x11b   : > { %4408 = vmatmul.mubr.f32.gmra.mrb[28].mxu0 %v6117_v0  ;;  %4067 = vmatmul.mubr.f32.gmra.mrb[14].mxu1 %v6016_v54 }
 0x11c   : > { %4410 = vmatprep.mubr.f32.mxu0 %v6047_v45  ;;  %4069 = vmatprep.mubr.f32.mxu1 %v6023_v39 }
 0x11d   : > { %4700 = vmatpush3.bf16.msra.mxu1 %v4697_v21  ;;  %v2837_v21 = vld [vmem:[#allocation6 + $0x460] sm:$0xff] }
 0x11e   : > { %4861 = vmatprep.subr.bf16.mxu1 %v6661_v53  ;;  %v4853_v26 = vpack.c.bf16 %v2838_v37, %v2837_v21  ;;  %v5206_v21 = vld [vmem:[#allocation2 + $0x48] sm:$0xff]  ;;  %v6687_v37 = vld [vmem:[#allocation47_spill] sm:$0xff] }
 0x11f   : > { %4411 = vmatmul.mubr.f32.gmra.mrb[30].mxu0 %v6047_v45  ;;  %4070 = vmatmul.mubr.f32.gmra.mrb[16].mxu1 %v6035_v3 }
 0x120   : > { %4445 = vmatprep.mubr.f32.mxu0 %v6660_v31  ;;  %4072 = vmatprep.mubr.f32.mxu1 %v6039_v42  ;;  %v6673_v31 = vld [vmem:[#allocation61_spill] sm:$0xff] }
 0x123   : > { %4446 = vmatmul.mubr.f32.vlgmr.msra.gmra.mrb[0].mxu0 %v6662_v46  ;;  %4073 = vmatmul.mubr.f32.gmra.mrb[18].mxu1 %v6052_v58  ;;  %v2839_v46 = vld [vmem:[#allocation6 + $0x470] sm:$0xff] }
 0x124   : > { %4832 = vmatpush3.bf16.msra.mxu0 %v6190_v62  ;;  %4448 = vmatprep.mubr.f32.mxu0 %v6663_v27  ;;  %v2833_v62 = vld [vmem:[#allocation6 + $0x440] sm:$0xff]  ;;  %v2840_v27 = vld [vmem:[#allocation6 + $0x478] sm:$0xff] }
 0x125   : > { %4834 = vmatprep.subr.bf16.mxu0 %v4833_v41  ;;  %4075 = vmatprep.mubr.f32.mxu1 %v6056_v48  ;;  %v4845_v5 = vpack.c.bf16 %v2834_v56, %v2833_v62  ;;  %v6681_v62 = vld [vmem:[#allocation38_spill] sm:$0xff] }
 0x126   : > { %v5202_v56 = vld [vmem:[#allocation2 + $0x18] sm:$0xff] }
 0x127   : > { %4449 = vmatmul.mubr.f32.gmra.mrb[2].mxu0 %v6664_v40  ;;  %4076 = vmatmul.mubr.f32.gmra.mrb[20].mxu1 %v6067_v19  ;;  %v4857_v40 = vpack.c.bf16 %v2840_v27, %v2839_v46  ;;  %v6690_v46 = vld [vmem:[#allocation51_spill] sm:$0xff]  ;;  %v6691_v27 = vld [vmem:[#allocation18_spill] sm:$0xff] }
 0x128   : > { %4451 = vmatprep.mubr.f32.mxu0 %v6665_v15  ;;  %4836 = vmatpush3.bf16.msra.mxu0 %v4833_v41  ;;  %v6674_v41 = vld [vmem:[#allocation33_spill] sm:$0xff]  ;;  %v6679_v15 = vld [vmem:[#allocation36_spill] sm:$0xff] }
 0x129   : > { %4838 = vmatprep.subr.bf16.mxu0 %v4837_v32  ;;  %4078 = vmatprep.mubr.f32.mxu1 %v6071_v8 }
 0x12b   : > { %4452 = vmatmul.mubr.f32.gmra.mrb[4].mxu0 %v6666_v9  ;;  %4079 = vmatmul.mubr.f32.gmra.mrb[22].mxu1 %v6080_v34  ;;  %v6682_v9 = vld [vmem:[#allocation39_spill] sm:$0xff] }
 0x12c   : > { %4454 = vmatprep.mubr.f32.mxu0 %v6667_v55  ;;  %4840 = vmatpush3.bf16.msra.mxu0 %v4837_v32  ;;  %v6676_v32 = vld [vmem:[#allocation34_spill] sm:$0xff]  ;;  %v5203_v55 = vld [vmem:[#allocation2 + $0x20] sm:$0xff] }
 0x12d   : > { %4842 = vmatprep.subr.bf16.mxu0 %v4841_v36  ;;  %4081 = vmatprep.mubr.f32.mxu1 %v6669_v29 }
 0x12f   : > { %4455 = vmatmul.mubr.f32.gmra.mrb[6].mxu0 %v6668_v23  ;;  %4082 = vmatmul.mubr.f32.gmra.mrb[24].mxu1 %v6671_v7  ;;  %v6685_v23 = vld [vmem:[#allocation16_spill] sm:$0xff] }
 0x130   : > { %4457 = vmatprep.mubr.f32.mxu0 %v6670_v51  ;;  %4844 = vmatpush3.bf16.msra.mxu0 %v4841_v36  ;;  %v6680_v36 = vld [vmem:[#allocation37_spill] sm:$0xff]  ;;  %v5205_v51 = vld [vmem:[#allocation2 + $0x38] sm:$0xff] }
 0x131   : > { %4846 = vmatprep.subr.bf16.mxu0 %v4845_v5  ;;  %4084 = vmatprep.mubr.f32.mxu1 %v6673_v31 }
 0x133   : > { %4458 = vmatmul.mubr.f32.gmra.mrb[8].mxu0 %v6672_v60  ;;  %4085 = vmatmul.mubr.f32.gmra.mrb[26].mxu1 %v6675_v59  ;;  %v6688_v60 = vld [vmem:[#allocation17_spill] sm:$0xff] }
 0x134   : > { %4460 = vmatprep.mubr.f32.mxu0 %v6674_v41  ;;  %4848 = vmatpush3.bf16.msra.mxu0 %v4845_v5  ;;  %v6683_v5 = vld [vmem:[#allocation41_spill] sm:$0xff] }
 0x135   : > { %4850 = vmatprep.subr.bf16.mxu0 %v4849_v6  ;;  %4087 = vmatprep.mubr.f32.mxu1 %v6677_v44  ;;  %v5207_v41 = vld [vmem:[#allocation2 + $0x50] sm:$0xff] }
 0x137   : > { %4461 = vmatmul.mubr.f32.gmra.mrb[10].mxu0 %v6676_v32  ;;  %4088 = vmatmul.mubr.f32.gmra.mrb[28].mxu1 %v6123_v11  ;;  %v5209_v32 = vld [vmem:[#allocation2 + $0x68] sm:$0xff] }
 0x138   : > { %4463 = vmatprep.mubr.f32.mxu0 %v6678_v33  ;;  %4852 = vmatpush3.bf16.msra.mxu0 %v4849_v6  ;;  %v6686_v6 = vld [vmem:[#allocation45_spill] sm:$0xff] }
 0x139   : > { %4854 = vmatprep.subr.bf16.mxu0 %v4853_v26  ;;  %4090 = vmatprep.mubr.f32.mxu1 %v6127_v63  ;;  %v6692_v33 = vld [vmem:[#allocation53_spill] sm:$0xff] }
 0x13b   : > { %4464 = vmatmul.mubr.f32.gmra.mrb[12].mxu0 %v6679_v15  ;;  %4091 = vmatmul.mubr.f32.gmra.mrb[30].mxu1 %v6138_v24  ;;  %v6693_v15 = vld [vmem:[#allocation54_spill] sm:$0xff] }
 0x13c   : > { %4466 = vmatprep.mubr.f32.mxu0 %v6680_v36  ;;  %4856 = vmatpush3.bf16.msra.mxu0 %v4853_v26  ;;  %v5208_v26 = vld [vmem:[#allocation2 + $0x60] sm:$0xff] }
 0x13d   : > { %4858 = vmatprep.subr.bf16.mxu0 %v4857_v40  ;;  %4125 = vmatprep.mubr.f32.mxu1 %v5202_v56  ;;  %v1697_v56 = vrot.slane %v6115_v47, 1 }
 0x13f   : > { %4467 = vmatmul.mubr.f32.gmra.mrb[14].mxu0 %v6681_v62  ;;  %4126 = vmatmul.mubr.f32.vlgmr.msra.gmra.mrb[0].mxu1 %v5203_v55  ;;  %v1698_v55 = vrot.slane %v6117_v0, 1 }
 0x140   : > { %4469 = vmatprep.mubr.f32.mxu0 %v6682_v9  ;;  %4860 = vmatpush3.bf16.msra.mxu0 %v4857_v40  ;;  %v5210_v40 = vld [vmem:[#allocation2 + $0x78] sm:$0xff] }
 0x141   : > { %4869 = vmatpush3.bf16.msra.mxu1 %v6661_v53  ;;  %4128 = vmatprep.mubr.f32.mxu1 %v5204_v22  ;;  %v6689_v53 = vld [vmem:[#allocation49_spill] sm:$0xff]  ;;  %v6694_v22 = vld [vmem:[#allocation19_spill] sm:$0xff] }
 0x142   : > { %4862 = vmatprep.subr.bf16.mxu1 %v6685_v23 }
 0x143   : > { %4470 = vmatmul.mubr.f32.gmra.mrb[16].mxu0 %v6683_v5  ;;  %4129 = vmatmul.mubr.f32.gmra.mrb[2].mxu1 %v5205_v51  ;;  %v6695_v51 = vld [vmem:[#allocation56_spill] sm:$0xff] }
 0x144   : > { %4472 = vmatprep.mubr.f32.mxu0 %v6684_v17  ;;  %4131 = vmatprep.mubr.f32.mxu1 %v5206_v21  ;;  %v5212_v21 = vld [vmem:[#allocation2 + $0x90] sm:$0xff] }
 0x145   : > { %4870 = vmatpush3.bf16.msra.mxu1 %v6685_v23  ;;  %v5211_v23 = vld [vmem:[#allocation2 + $0x80] sm:$0xff] }
 0x146   : > { %4863 = vmatprep.subr.bf16.mxu1 %v6688_v60 }
 0x147   : > { %4473 = vmatmul.mubr.f32.gmra.mrb[18].mxu0 %v6686_v6  ;;  %4132 = vmatmul.mubr.f32.gmra.mrb[4].mxu1 %v5207_v41  ;;  %v1700_v41 = vrot.slane %v6131_v49, 1 }
 0x148   : > { %4475 = vmatprep.mubr.f32.mxu0 %v6687_v37  ;;  %4134 = vmatprep.mubr.f32.mxu1 %v5208_v26  ;;  %v2536_v26 = vrot.slane %v6047_v45, 1 }
 0x149   : > { %4871 = vmatpush3.bf16.msra.mxu1 %v6688_v60  ;;  %v6696_v60 = vld [vmem:[#allocation57_spill] sm:$0xff]  ;;  %v6296_v49 = vsel %vm453_vm0, %v1698_v55, %v1700_v41  ;;  %v5218_v41 = vld [vmem:[#allocation2 + $0xd8] sm:$0xff] }
 0x14a   : > { %4864 = vmatprep.subr.bf16.mxu1 %v6691_v27 }
 0x14b   : > { %4476 = vmatmul.mubr.f32.gmra.mrb[20].mxu0 %v6689_v53  ;;  %4135 = vmatmul.mubr.f32.gmra.mrb[6].mxu1 %v5209_v32  ;;  %v6290_v32 = vld [vmem:[#allocation2 + $0x1a8] sm:$0x3] }
 0x14c   : > { %4478 = vmatprep.mubr.f32.mxu0 %v6690_v46  ;;  %4137 = vmatprep.mubr.f32.mxu1 %v5210_v40  ;;  %v6698_v40 = vld [vmem:[#allocation20_spill] sm:$0xff]  ;;  %v2539_v45 = vrot.slane %v6290_v32, 1 }
 0x14d   : > { %4872 = vmatpush3.bf16.msra.mxu1 %v6691_v27  ;;  %v6288_v27 = vsel %vm453_vm0, %v1697_v56, %v1698_v55  ;;  %v6700_v56 = vld [vmem:[#allocation21_spill] sm:$0xff]  ;;  %v5217_v55 = vld [vmem:[#allocation2 + $0xc8] sm:$0xff] }
 0x14e   : > { %4865 = vmatprep.subr.bf16.mxu1 %v6694_v22  ;;  %6697 = vst [vmem:[#allocation40_spill] sm:$0xff] %v6288_v27 }
 0x14f   : > { %4479 = vmatmul.mubr.f32.gmra.mrb[22].mxu0 %v6692_v33  ;;  %4138 = vmatmul.mubr.f32.gmra.mrb[8].mxu1 %v5211_v23  ;;  %v5213_v23 = vld [vmem:[#allocation2 + $0x98] sm:$0xff] }
 0x150   : > { %4481 = vmatprep.mubr.f32.mxu0 %v6693_v15  ;;  %4140 = vmatprep.mubr.f32.mxu1 %v5212_v21  ;;  %v5214_v21 = vld [vmem:[#allocation2 + $0xa8] sm:$0xff] }
 0x151   : > { %4873 = vmatpush3.bf16.msra.mxu1 %v6694_v22  ;;  %v5215_v22 = vld [vmem:[#allocation2 + $0xb0] sm:$0xff] }
 0x152   : > { %4866 = vmatprep.subr.bf16.mxu1 %v6698_v40 }
 0x153   : > { %4482 = vmatmul.mubr.f32.gmra.mrb[24].mxu0 %v6695_v51  ;;  %4141 = vmatmul.mubr.f32.gmra.mrb[10].mxu1 %v5213_v23  ;;  %v5216_v23 = vld [vmem:[#allocation2 + $0xc0] sm:$0xff] }
 0x154   : > { %4484 = vmatprep.mubr.f32.mxu0 %v6696_v60  ;;  %4143 = vmatprep.mubr.f32.mxu1 %v5214_v21  ;;  %v2540_v21 = vsel %vm453_vm0, %v2536_v26, %v2539_v45  ;;  %v5222_v45 = vld [vmem:[#allocation2 + $0x108] sm:$0xff] }
 0x155   : > { %4874 = vmatpush3.bf16.msra.mxu1 %v6698_v40  ;;  %v5219_v40 = vld [vmem:[#allocation2 + $0xe0] sm:$0xff] }
 0x156   : > { %4867 = vmatprep.subr.bf16.mxu1 %v6700_v56 }
 0x157   : > { %4485 = vmatmul.mubr.f32.gmra.mrb[26].mxu0 %v6699_v38  ;;  %4144 = vmatmul.mubr.f32.gmra.mrb[12].mxu1 %v5215_v22  ;;  %v5220_v22 = vld [vmem:[#allocation2 + $0xf0] sm:$0xff] }
 0x158   : > { %4487 = vmatprep.mubr.f32.mxu0 %v6288_v27  ;;  %4146 = vmatprep.mubr.f32.mxu1 %v5216_v23  ;;  %v6701_v27 = vld [vmem:[#allocation22_spill] sm:$0xff] }
 0x159   : > { %4875 = vmatpush3.bf16.msra.mxu1 %v6700_v56  ;;  %v5223_v56 = vld [vmem:[#allocation2 + $0x110] sm:$0xff] }
 0x15a   : > { %4868 = vmatprep.subr.bf16.mxu1 %v6701_v27 }
 0x15b   : > { %4488 = vmatmul.mubr.f32.gmra.mrb[28].mxu0 %v6296_v49  ;;  %4147 = vmatmul.mubr.f32.gmra.mrb[14].mxu1 %v5217_v55 }
 0x15c   : > { %4490 = vmatprep.mubr.f32.mxu0 %v2536_v26  ;;  %4149 = vmatprep.mubr.f32.mxu1 %v5218_v41  ;;  %v5221_v26 = vld [vmem:[#allocation2 + $0xf8] sm:$0xff] }
 0x15d   : > { %4876 = vmatpush3.bf16.msra.mxu1 %v6701_v27 }
 0x15f   : > { %4491 = vmatmul.mubr.f32.gmra.mrb[30].mxu0 %v2540_v21  ;;  %4150 = vmatmul.mubr.f32.gmra.mrb[16].mxu1 %v5219_v40 }
 0x160   : > { %4525 = vmatprep.mubr.f32.mxu0 %v5862_v14  ;;  %4152 = vmatprep.mubr.f32.mxu1 %v5220_v22  ;;  %v5224_v14 = vld [vmem:[#allocation2 + $0x120] sm:$0xff] }
 0x163   : > { %4526 = vmatmul.mubr.f32.vlgmr.msra.gmra.mrb[0].mxu0 %v5878_v1  ;;  %4153 = vmatmul.mubr.f32.gmra.mrb[18].mxu1 %v5221_v26  ;;  %v5225_v1 = vld [vmem:[#allocation2 + $0x128] sm:$0xff] }
 0x164   : > { %4528 = vmatprep.mubr.f32.mxu0 %v6652_v12  ;;  %4155 = vmatprep.mubr.f32.mxu1 %v5222_v45 }
 0x167   : > { %4529 = vmatmul.mubr.f32.gmra.mrb[2].mxu0 %v6653_v50  ;;  %4156 = vmatmul.mubr.f32.gmra.mrb[20].mxu1 %v5223_v56 }
 0x168   : > { %4531 = vmatprep.mubr.f32.mxu0 %v6654_v16  ;;  %4158 = vmatprep.mubr.f32.mxu1 %v5224_v14 }
 0x16b   : > { %4532 = vmatmul.mubr.f32.gmra.mrb[4].mxu0 %v6655_v20  ;;  %4159 = vmatmul.mubr.f32.gmra.mrb[22].mxu1 %v5225_v1 }
 0x16c   : > { %4534 = vmatprep.mubr.f32.mxu0 %v6656_v30  ;;  %4161 = vmatprep.mubr.f32.mxu1 %v5923_v28  ;;  %v2820_v28 = vrot.slane %v6290_v32, 2 }
 0x16f   : > { %4535 = vmatmul.mubr.f32.gmra.mrb[6].mxu0 %v6657_v52  ;;  %4162 = vmatmul.mubr.f32.gmra.mrb[24].mxu1 %v5925_v13  ;;  %v6702_v13 = vld [vmem:[#allocation40_spill] sm:$0xff] }
 0x170   : > { %4537 = vmatprep.mubr.f32.mxu0 %v6658_v10  ;;  %4164 = vmatprep.mubr.f32.mxu1 %v5951_v57 }
 0x173   : > { %4538 = vmatmul.mubr.f32.gmra.mrb[8].mxu0 %v5990_v43  ;;  %4165 = vmatmul.mubr.f32.gmra.mrb[26].mxu1 %v5953_v2 }
 0x174   : > { %4540 = vmatprep.mubr.f32.mxu0 %v6659_v35  ;;  %4167 = vmatprep.mubr.f32.mxu1 %v5979_v4  ;;  %v6703_v4 = vld [vmem:[#allocation64_spill] sm:$0xff] }
 0x175   : > { %v2821_v57 = vsel %vm1033_vm2, %v6703_v4, %v2820_v28 }
 0x177   : > { %4541 = vmatmul.mubr.f32.gmra.mrb[10].mxu0 %v6016_v54  ;;  %4168 = vmatmul.mubr.f32.gmra.mrb[28].mxu1 %v5981_v61 }
 0x178   : > { %4543 = vmatprep.mubr.f32.mxu0 %v6023_v39  ;;  %4170 = vmatprep.mubr.f32.mxu1 %v6115_v47 }
 0x17b   : > { %4544 = vmatmul.mubr.f32.gmra.mrb[12].mxu0 %v6035_v3  ;;  %4171 = vmatmul.mubr.f32.gmra.mrb[30].mxu1 %v6117_v0 }
 0x17c   : > { %4546 = vmatprep.mubr.f32.mxu0 %v6039_v42  ;;  %4229 = vmatprep.mubr.f32.mxu1 %v6680_v36 }
 0x17f   : > { %4547 = vmatmul.mubr.f32.gmra.mrb[14].mxu0 %v6052_v58  ;;  %4230 = vmatmul.mubr.f32.vlgmr.msra.gmra.mrb[16].mxu1 %v6681_v62 }
 0x180   : > { %4549 = vmatprep.mubr.f32.mxu0 %v6056_v48  ;;  %4232 = vmatprep.mubr.f32.mxu1 %v6682_v9 }
 0x183   : > { %4550 = vmatmul.mubr.f32.gmra.mrb[16].mxu0 %v6067_v19  ;;  %4233 = vmatmul.mubr.f32.gmra.mrb[18].mxu1 %v6683_v5 }
 0x184   : > { %4552 = vmatprep.mubr.f32.mxu0 %v6071_v8  ;;  %4235 = vmatprep.mubr.f32.mxu1 %v6684_v17 }
 0x187   : > { %4553 = vmatmul.mubr.f32.gmra.mrb[18].mxu0 %v6080_v34  ;;  %4236 = vmatmul.mubr.f32.gmra.mrb[20].mxu1 %v6686_v6 }
 0x188   : > { %4555 = vmatprep.mubr.f32.mxu0 %v6669_v29  ;;  %4238 = vmatprep.mubr.f32.mxu1 %v6687_v37 }
 0x18b   : > { %4556 = vmatmul.mubr.f32.gmra.mrb[20].mxu0 %v6671_v7  ;;  %4239 = vmatmul.mubr.f32.gmra.mrb[22].mxu1 %v6689_v53 }
 0x18c   : > { %4558 = vmatprep.mubr.f32.mxu0 %v6673_v31  ;;  %4241 = vmatprep.mubr.f32.mxu1 %v6690_v46 }
 0x18f   : > { %4559 = vmatmul.mubr.f32.gmra.mrb[22].mxu0 %v6675_v59  ;;  %4242 = vmatmul.mubr.f32.gmra.mrb[24].mxu1 %v6692_v33 }
 0x190   : > { %4561 = vmatprep.mubr.f32.mxu0 %v6677_v44  ;;  %4244 = vmatprep.mubr.f32.mxu1 %v6693_v15 }
 0x193   : > { %4562 = vmatmul.mubr.f32.gmra.mrb[24].mxu0 %v6123_v11  ;;  %4245 = vmatmul.mubr.f32.gmra.mrb[26].mxu1 %v6695_v51 }
 0x194   : > { %4564 = vmatprep.mubr.f32.mxu0 %v6127_v63  ;;  %4247 = vmatprep.mubr.f32.mxu1 %v6696_v60 }
 0x197   : > { %4565 = vmatmul.mubr.f32.gmra.mrb[26].mxu0 %v6138_v24  ;;  %4248 = vmatmul.mubr.f32.gmra.mrb[28].mxu1 %v6699_v38 }
 0x198   : > { %4567 = vmatprep.mubr.f32.mxu0 %v6142_v25  ;;  %4250 = vmatprep.mubr.f32.mxu1 %v6702_v13 }
 0x19b   : > { %4568 = vmatmul.mubr.f32.gmra.mrb[28].mxu0 %v6149_v18  ;;  %4251 = vmatmul.mubr.f32.gmra.mrb[30].mxu1 %v6296_v49 }
 0x19c   : > { %4570 = vmatprep.mubr.f32.mxu0 %v6703_v4 }
 0x19f   : > { %4571 = vmatmul.mubr.f32.gmra.mrb[30].mxu0 %v2821_v57 }
 0x212   : > { %v4127_v2 = vpop.f32.mrb[0].mxu1 }
 0x213   : > { %v1503_v61 = vpop.f32.mrb[1].mxu1 }
 0x216   : > { %v4130_v39 = vpop.f32.mrb[2].mxu1 }
 0x217   : > { %v1513_v43 = vpop.f32.mrb[3].mxu1 }
 0x21a   : > { %v4133_v54 = vpop.f32.mrb[4].mxu1 }
 0x21b   : > { %v1523_v3 = vpop.f32.mrb[5].mxu1 }
 0x21e   : > { %v4136_v42 = vpop.f32.mrb[6].mxu1 }
 0x21f   : > { %v1533_v58 = vpop.f32.mrb[7].mxu1 }
 0x222   : > { %v4139_v48 = vpop.f32.mrb[8].mxu1 }
 0x223   : > { %v1543_v19 = vpop.f32.mrb[9].mxu1 }
 0x226   : > { %v4142_v8 = vpop.f32.mrb[10].mxu1 }
 0x227   : > { %v6364_v34 = vpop.f32.mrb[11].mxu1 }
 0x22a   : > { %v6366_v47 = vpop.f32.mrb[12].mxu1 }
 0x22b   : > { %v6368_v0 = vpop.f32.mrb[13].mxu1 }
 0x22e   : > { %v6370_v11 = vpop.f32.mrb[14].mxu1 }
 0x22f   : > { %v6372_v63 = vpop.f32.mrb[15].mxu1 }
 0x236   : > { %v4527_v24 = vpop.f32.mrb[0].mxu0 }
 0x237   : > { %v4877_v25 = vadd.f32 %v4527_v24, %v4127_v2  ;;  %v2907_v18 = vpop.f32.mrb[1].mxu0 }
 0x238   : > { %v4878_v38 = vadd.f32 %v2907_v18, %v1503_v61 }
 0x239   : > { %3099 = vst [vmem:[%s6376_s18 + $0x8] sm:$0xff] %v4877_v25  ;;  %v3168_v12 = vmul.f32 %v4877_v25, %v4877_v25 }
 0x23a   : > { %3098 = vst [vmem:[%s6376_s18] sm:$0xff] %v4878_v38  ;;  %v3130_v50 = vadd.f32 %v4878_v38, %v4877_v25  ;;  %v3167_v16 = vmul.f32 %v4878_v38, %v4878_v38  ;;  %v4530_v20 = vpop.f32.mrb[2].mxu0 }
 0x23b   : > { %v4879_v30 = vadd.f32 %v4530_v20, %v4130_v39  ;;  %v2917_v52 = vpop.f32.mrb[3].mxu0 }
 0x23c   : > { %v3199_v10 = vadd.f32 %v3168_v12, %v3167_v16  ;;  %v4880_v35 = vadd.f32 %v2917_v52, %v1513_v43 }
 0x23d   : > { %3101 = vst [vmem:[%s6376_s18 + $0x18] sm:$0xff] %v4879_v30  ;;  %v3170_v36 = vmul.f32 %v4879_v30, %v4879_v30 }
 0x23e   : > { %3100 = vst [vmem:[%s6376_s18 + $0x10] sm:$0xff] %v4880_v35  ;;  %v3131_v29 = vadd.f32 %v4880_v35, %v3130_v50  ;;  %v3169_v7 = vmul.f32 %v4880_v35, %v4880_v35  ;;  %v4533_v31 = vpop.f32.mrb[4].mxu0 }
 0x23f   : > { %v4881_v59 = vadd.f32 %v4533_v31, %v4133_v54  ;;  %v2927_v44 = vpop.f32.mrb[5].mxu0 }
 0x240   : > { %v3200_v62 = vadd.f32 %v3199_v10, %v3169_v7  ;;  %v4882_v9 = vadd.f32 %v2927_v44, %v1523_v3  ;;  %v3132_v5 = vadd.f32 %v4879_v30, %v3131_v29 }
 0x241   : > { %3103 = vst [vmem:[%s6376_s18 + $0x28] sm:$0xff] %v4881_v59  ;;  %v3172_v15 = vmul.f32 %v4881_v59, %v4881_v59 }
 0x242   : > { %3102 = vst [vmem:[%s6376_s18 + $0x20] sm:$0xff] %v4882_v9  ;;  %v3133_v17 = vadd.f32 %v4882_v9, %v3132_v5  ;;  %v3171_v6 = vmul.f32 %v4882_v9, %v4882_v9  ;;  %v3201_v37 = vadd.f32 %v3200_v62, %v3170_v36  ;;  %v4536_v53 = vpop.f32.mrb[6].mxu0 }
 0x243   : > { %v4883_v46 = vadd.f32 %v4536_v53, %v4136_v42  ;;  %v2937_v33 = vpop.f32.mrb[7].mxu0 }
 0x244   : > { %v3202_v51 = vadd.f32 %v3201_v37, %v3171_v6  ;;  %v4884_v60 = vadd.f32 %v2937_v33, %v1533_v58  ;;  %v3134_v27 = vadd.f32 %v4881_v59, %v3133_v17 }
 0x245   : > { %3105 = vst [vmem:[%s6376_s18 + $0x38] sm:$0xff] %v4883_v46  ;;  %v3174_v40 = vmul.f32 %v4883_v46, %v4883_v46 }
 0x246   : > { %3104 = vst [vmem:[%s6376_s18 + $0x30] sm:$0xff] %v4884_v60  ;;  %v3135_v32 = vadd.f32 %v4884_v60, %v3134_v27  ;;  %v3173_v49 = vmul.f32 %v4884_v60, %v4884_v60  ;;  %v3203_v23 = vadd.f32 %v3202_v51, %v3172_v15  ;;  %v4539_v21 = vpop.f32.mrb[8].mxu0 }
 0x247   : > { %v4885_v55 = vadd.f32 %v4539_v21, %v4139_v48  ;;  %v2947_v41 = vpop.f32.mrb[9].mxu0 }
 0x248   : > { %v3204_v22 = vadd.f32 %v3203_v23, %v3173_v49  ;;  %v4886_v26 = vadd.f32 %v2947_v41, %v1543_v19  ;;  %v3136_v45 = vadd.f32 %v4883_v46, %v3135_v32 }
 0x249   : > { %3107 = vst [vmem:[%s6376_s18 + $0x48] sm:$0xff] %v4885_v55  ;;  %v3176_v57 = vmul.f32 %v4885_v55, %v4885_v55 }
 0x24a   : > { %3106 = vst [vmem:[%s6376_s18 + $0x40] sm:$0xff] %v4886_v26  ;;  %v3137_v56 = vadd.f32 %v4886_v26, %v3136_v45  ;;  %v3175_v14 = vmul.f32 %v4886_v26, %v4886_v26  ;;  %v3205_v1 = vadd.f32 %v3204_v22, %v3174_v40  ;;  %v4542_v28 = vpop.f32.mrb[10].mxu0 }
 0x24b   : > { %v4887_v13 = vadd.f32 %v4542_v28, %v4142_v8  ;;  %v2957_v4 = vpop.f32.mrb[11].mxu0 }
 0x24c   : > { %v3206_v2 = vadd.f32 %v3205_v1, %v3175_v14  ;;  %v4888_v61 = vadd.f32 %v2957_v4, %v6364_v34  ;;  %v3138_v39 = vadd.f32 %v4885_v55, %v3137_v56 }
 0x24d   : > { %3109 = vst [vmem:[%s6376_s18 + $0x58] sm:$0xff] %v4887_v13  ;;  %v3178_v19 = vmul.f32 %v4887_v13, %v4887_v13 }
 0x24e   : > { %3108 = vst [vmem:[%s6376_s18 + $0x50] sm:$0xff] %v4888_v61  ;;  %v3139_v43 = vadd.f32 %v4888_v61, %v3138_v39  ;;  %v3177_v54 = vmul.f32 %v4888_v61, %v4888_v61  ;;  %v3207_v3 = vadd.f32 %v3206_v2, %v3176_v57  ;;  %v4545_v42 = vpop.f32.mrb[12].mxu0 }
 0x24f   : > { %v4889_v58 = vadd.f32 %v4545_v42, %v6366_v47  ;;  %v2967_v48 = vpop.f32.mrb[13].mxu0 }
 0x250   : > { %v3208_v8 = vadd.f32 %v3207_v3, %v3177_v54  ;;  %v4890_v24 = vadd.f32 %v2967_v48, %v6368_v0  ;;  %v3140_v25 = vadd.f32 %v4887_v13, %v3139_v43 }
 0x251   : > { %3111 = vst [vmem:[%s6376_s18 + $0x68] sm:$0xff] %v4889_v58  ;;  %v3180_v20 = vmul.f32 %v4889_v58, %v4889_v58 }
 0x252   : > { %3110 = vst [vmem:[%s6376_s18 + $0x60] sm:$0xff] %v4890_v24  ;;  %v3141_v34 = vadd.f32 %v4890_v24, %v3140_v25  ;;  %v3179_v18 = vmul.f32 %v4890_v24, %v4890_v24  ;;  %v3209_v38 = vadd.f32 %v3208_v8, %v3178_v19  ;;  %v4548_v12 = vpop.f32.mrb[14].mxu0  ;;  %v4231_v0 = vpop.f32.mrb[16].mxu1 }
 0x253   : > { %v4891_v50 = vadd.f32 %v4548_v12, %v6370_v11  ;;  %v2977_v16 = vpop.f32.mrb[15].mxu0  ;;  %v1867_v31 = vpop.f32.mrb[17].mxu1 }
 0x254   : > { %v3210_v30 = vadd.f32 %v3209_v38, %v3179_v18  ;;  %v4892_v47 = vadd.f32 %v2977_v16, %v6372_v63  ;;  %v3142_v52 = vadd.f32 %v4889_v58, %v3141_v34 }
 0x255   : > { %3113 = vst [vmem:[%s6376_s18 + $0x78] sm:$0xff] %v4891_v50  ;;  %v3182_v36 = vmul.f32 %v4891_v50, %v4891_v50 }
 0x256   : > { %3112 = vst [vmem:[%s6376_s18 + $0x70] sm:$0xff] %v4892_v47  ;;  %v3143_v10 = vadd.f32 %v4892_v47, %v3142_v52  ;;  %v3181_v35 = vmul.f32 %v4892_v47, %v4892_v47  ;;  %v3211_v29 = vadd.f32 %v3210_v30, %v3180_v20  ;;  %v4551_v7 = vpop.f32.mrb[16].mxu0  ;;  %v4234_v63 = vpop.f32.mrb[18].mxu1 }
 0x257   : > { %v4893_v59 = vadd.f32 %v4551_v7, %v4231_v0  ;;  %v2987_v44 = vpop.f32.mrb[17].mxu0  ;;  %v1877_v53 = vpop.f32.mrb[19].mxu1 }
 0x258   : > { %v3212_v11 = vadd.f32 %v3211_v29, %v3181_v35  ;;  %v4894_v62 = vadd.f32 %v2987_v44, %v1867_v31  ;;  %v3144_v9 = vadd.f32 %v4891_v50, %v3143_v10 }
 0x259   : > { %3115 = vst [vmem:[%s6376_s18 + $0x88] sm:$0xff] %v4893_v59  ;;  %v3184_v15 = vmul.f32 %v4893_v59, %v4893_v59 }
 0x25a   : > { %3114 = vst [vmem:[%s6376_s18 + $0x80] sm:$0xff] %v4894_v62  ;;  %v3145_v5 = vadd.f32 %v4894_v62, %v3144_v9  ;;  %v3183_v17 = vmul.f32 %v4894_v62, %v4894_v62  ;;  %v3213_v6 = vadd.f32 %v3212_v11, %v3182_v36  ;;  %v4554_v37 = vpop.f32.mrb[18].mxu0  ;;  %v4237_v32 = vpop.f32.mrb[20].mxu1 }
 0x25b   : > { %v4895_v46 = vadd.f32 %v4554_v37, %v4234_v63  ;;  %v2997_v33 = vpop.f32.mrb[19].mxu0  ;;  %v1887_v41 = vpop.f32.mrb[21].mxu1 }
 0x25c   : > { %v3214_v51 = vadd.f32 %v3213_v6, %v3183_v17  ;;  %v4896_v60 = vadd.f32 %v2997_v33, %v1877_v53  ;;  %v3146_v27 = vadd.f32 %v4893_v59, %v3145_v5 }
 0x25d   : > { %3117 = vst [vmem:[%s6376_s18 + $0x98] sm:$0xff] %v4895_v46  ;;  %v3186_v26 = vmul.f32 %v4895_v46, %v4895_v46 }
 0x25e   : > { %3116 = vst [vmem:[%s6376_s18 + $0x90] sm:$0xff] %v4896_v60  ;;  %v3147_v49 = vadd.f32 %v4896_v60, %v3146_v27  ;;  %v3185_v23 = vmul.f32 %v4896_v60, %v4896_v60  ;;  %v3215_v21 = vadd.f32 %v3214_v51, %v3184_v15  ;;  %v4557_v55 = vpop.f32.mrb[20].mxu0  ;;  %v4240_v1 = vpop.f32.mrb[22].mxu1 }
 0x25f   : > { %v4897_v40 = vadd.f32 %v4557_v55, %v4237_v32  ;;  %v3007_v22 = vpop.f32.mrb[21].mxu0  ;;  %v1897_v2 = vpop.f32.mrb[23].mxu1 }
 0x260   : > { %v3216_v45 = vadd.f32 %v3215_v21, %v3185_v23  ;;  %v4898_v56 = vadd.f32 %v3007_v22, %v1887_v41  ;;  %v3148_v14 = vadd.f32 %v4895_v46, %v3147_v49 }
 0x261   : > { %3119 = vst [vmem:[%s6376_s18 + $0xa8] sm:$0xff] %v4897_v40  ;;  %v3188_v43 = vmul.f32 %v4897_v40, %v4897_v40 }
 0x262   : > { %3118 = vst [vmem:[%s6376_s18 + $0xa0] sm:$0xff] %v4898_v56  ;;  %v3149_v28 = vadd.f32 %v4898_v56, %v3148_v14  ;;  %v3187_v13 = vmul.f32 %v4898_v56, %v4898_v56  ;;  %v3217_v4 = vadd.f32 %v3216_v45, %v3186_v26  ;;  %v4560_v57 = vpop.f32.mrb[22].mxu0  ;;  %v4243_v58 = vpop.f32.mrb[24].mxu1 }
 0x263   : > { %v4899_v61 = vadd.f32 %v4560_v57, %v4240_v1  ;;  %v3017_v39 = vpop.f32.mrb[23].mxu0  ;;  %v1907_v25 = vpop.f32.mrb[25].mxu1 }
 0x264   : > { %v3218_v54 = vadd.f32 %v3217_v4, %v3187_v13  ;;  %v4900_v3 = vadd.f32 %v3017_v39, %v1897_v2  ;;  %v3150_v42 = vadd.f32 %v4897_v40, %v3149_v28 }
 0x265   : > { %3121 = vst [vmem:[%s6376_s18 + $0xb8] sm:$0xff] %v4899_v61  ;;  %v3190_v38 = vmul.f32 %v4899_v61, %v4899_v61 }
 0x266   : > { %3120 = vst [vmem:[%s6376_s18 + $0xb0] sm:$0xff] %v4900_v3  ;;  %v3151_v48 = vadd.f32 %v4900_v3, %v3150_v42  ;;  %v3189_v19 = vmul.f32 %v4900_v3, %v4900_v3  ;;  %v3219_v8 = vadd.f32 %v3218_v54, %v3188_v43  ;;  %v4563_v24 = vpop.f32.mrb[24].mxu0  ;;  %v4246_v20 = vpop.f32.mrb[26].mxu1 }
 0x267   : > { %v4901_v34 = vadd.f32 %v4563_v24, %v4243_v58  ;;  %v3027_v18 = vpop.f32.mrb[25].mxu0  ;;  %v1917_v10 = vpop.f32.mrb[27].mxu1 }
 0x268   : > { %v3220_v12 = vadd.f32 %v3219_v8, %v3189_v19  ;;  %v4902_v50 = vadd.f32 %v3027_v18, %v1907_v25  ;;  %v3152_v16 = vadd.f32 %v4899_v61, %v3151_v48 }
 0x269   : > { %3123 = vst [vmem:[%s6376_s18 + $0xc8] sm:$0xff] %v4901_v34  ;;  %v3192_v7 = vmul.f32 %v4901_v34, %v4901_v34 }
 0x26a   : > { %3122 = vst [vmem:[%s6376_s18 + $0xc0] sm:$0xff] %v4902_v50  ;;  %v3153_v30 = vadd.f32 %v4902_v50, %v3152_v16  ;;  %v3191_v47 = vmul.f32 %v4902_v50, %v4902_v50  ;;  %v3221_v52 = vadd.f32 %v3220_v12, %v3190_v38  ;;  %v4566_v0 = vpop.f32.mrb[26].mxu0  ;;  %v4249_v36 = vpop.f32.mrb[28].mxu1 }
 0x26b   : > { %v4903_v35 = vadd.f32 %v4566_v0, %v4246_v20  ;;  %v3037_v29 = vpop.f32.mrb[27].mxu0  ;;  %v1927_v5 = vpop.f32.mrb[29].mxu1 }
 0x26c   : > { %v3222_v31 = vadd.f32 %v3221_v52, %v3191_v47  ;;  %v4904_v59 = vadd.f32 %v3037_v29, %v1917_v10  ;;  %v3154_v44 = vadd.f32 %v4901_v34, %v3153_v30 }
 0x26d   : > { %3125 = vst [vmem:[%s6376_s18 + $0xd8] sm:$0xff] %v4903_v35  ;;  %v3194_v37 = vmul.f32 %v4903_v35, %v4903_v35 }
 0x26e   : > { %3124 = vst [vmem:[%s6376_s18 + $0xd0] sm:$0xff] %v4904_v59  ;;  %v3155_v11 = vadd.f32 %v4904_v59, %v3154_v44  ;;  %v3193_v62 = vmul.f32 %v4904_v59, %v4904_v59  ;;  %v3223_v9 = vadd.f32 %v3222_v31, %v3192_v7  ;;  %v4569_v63 = vpop.f32.mrb[28].mxu0  ;;  %v4252_v15 = vpop.f32.mrb[30].mxu1 }
 0x26f   : > { %v4905_v17 = vadd.f32 %v4569_v63, %v4249_v36  ;;  %v3047_v6 = vpop.f32.mrb[29].mxu0  ;;  %v1937_v49 = vpop.f32.mrb[31].mxu1 }
 0x270   : > { %v3224_v53 = vadd.f32 %v3223_v9, %v3193_v62  ;;  %v4906_v46 = vadd.f32 %v3047_v6, %v1927_v5  ;;  %v3156_v33 = vadd.f32 %v4903_v35, %v3155_v11 }
 0x271   : > { %3127 = vst [vmem:[%s6376_s18 + $0xe8] sm:$0xff] %v4905_v17  ;;  %v3196_v55 = vmul.f32 %v4905_v17, %v4905_v17 }
 0x272   : > { %3126 = vst [vmem:[%s6376_s18 + $0xe0] sm:$0xff] %v4906_v46  ;;  %v3157_v51 = vadd.f32 %v4906_v46, %v3156_v33  ;;  %v3195_v60 = vmul.f32 %v4906_v46, %v4906_v46  ;;  %v3225_v27 = vadd.f32 %v3224_v53, %v3194_v37  ;;  %v4572_v32 = vpop.f32.mrb[30].mxu0 }
 0x273   : > { %v4907_v23 = vadd.f32 %v4572_v32, %v4252_v15  ;;  %v3057_v21 = vpop.f32.mrb[31].mxu0 }
 0x274   : > { %v3226_v41 = vadd.f32 %v3225_v27, %v3195_v60  ;;  %v4908_v40 = vadd.f32 %v3057_v21, %v1937_v49  ;;  %v3158_v22 = vadd.f32 %v4905_v17, %v3157_v51 }
 0x275   : > { %3129 = vst [vmem:[%s6376_s18 + $0xf8] sm:$0xff] %v4907_v23 }
 0x276   : > { %3128 = vst [vmem:[%s6376_s18 + $0xf0] sm:$0xff] %v4908_v40  ;;  %v3159_v26 = vadd.f32 %v4908_v40, %v3158_v22  ;;  %v3197_v45 = vmul.f32 %v4908_v40, %v4908_v40  ;;  %v3227_v56 = vadd.f32 %v3226_v41, %v3196_v55 }
 0x277   : > { %5297 = shalt.err (!%p5294_p7)
}
 0x278   : > { %s5298_s29 = scalar_lea.hbm %s6418_s25, 4096  ;;  %s5302_s7 = scalar_lea.hbm %s6499_s2, 8192 }
 0x279   : > { %p5299_p9 = scmp.ne.s32.totalorder %s6418_s25, %s5298_s29  ;;  %p5303_p5 = scmp.lt.u32.totalorder %s6418_s25, %s6499_s2 }
 0x27a   : > { %p5304_p11 = scmp.lt.u32.totalorder %s5302_s7, %s5298_s29  ;;  %p5306_p4 = scmp.lt.u32.totalorder %s5298_s29, %s6418_s25 }
 0x27b   : > { %p5300_p1 = pnand %p5299_p9, %p5511_p12 }
 0x27c   : > { %p5305_p2 = por %p5304_p11, %p5303_p5 }
 0x27d   : > { %p5301_p0 = pneg %p5300_p1 }
 0x27e   : > { %p5307_p6 = por %p5306_p4, %p5305_p2 }
 0x280   : > { %p5308_p8 = pnand %p5307_p6, %p5301_p0 }
 0x282   : > { %5311 = shalt.err (!%p5308_p8)
}
 0x283   : > { %s5394_s18 = smov 128   ;;  %s5395_s20 = smov 8   ;;  %v3198_v14 = vmul.f32 %v4907_v23, %v4907_v23  ;;  %v3160_v1 = vadd.f32 %v4907_v23, %v3159_v26  ;;  %v3228_v28 = vadd.f32 %v3227_v56, %v3197_v45  ;;  %v3236_v13 = vlaneseq }
 0x284   : > { %5139 = dma.vmem_to_hbm [thread:$0]  (%p5511_p12), %s6420_s8, 4096, %s6418_s25, %s3254_s5, %s5394_s18, %s5394_s18, %s5395_s20  }
 0x285   : > { %v3161_v4 = vrot.slane %v3160_v1, 4  ;;  %v3229_v57 = vadd.f32 %v3228_v28, %v3198_v14  ;;  %v3237_v39 = vshrl.u32 %v3236_v13, 7  ;;  %s3411_s9 = sshll.u32 %s5562_s6, 3  ;;  %s3416_s8 = sshll.u32 %s5438_s16, 7 }
 0x286   : > { %s214_s4 = scalar_lea.vmem [#allocation9], %s3411_s9  ;;  %s6453_s27 = scalar_lea.hbm %s6500_s3, %s3416_s8 }
 0x287   : > { %v3162_v2 = vadd.f32 %v3161_v4, %v3160_v1  ;;  %v3230_v61 = vrot.slane %v3229_v57, 4  ;;  %v3242_v58 = vand.u32 1, %v3237_v39  ;;  %s3288_s25 = sshll.u32 %s214_s4, 4  ;;  %s3259_s28 = scalar_lea.sflag [#allocation10], %s5562_s6  ;;  %s6455_s25 = int_to_ptr.vmem [resolvable:$true] %s3288_s25 }
 0x288   : > { %s5312_s23 = scalar_lea.vmem %s6455_s25, 128  ;;  %s5396_s16 = smov [#allocation9]  }
 0x289   : > { %v3163_v43 = vrot.slane %v3162_v2, 2  ;;  %v3231_v54 = vadd.f32 %v3230_v61, %v3229_v57  ;;  %vm3250_vm3 = vcmp.eq.s32.totalorder %v3242_v58, 0  ;;  %p5313_p10 = scmp.ne.s32.totalorder %s6455_s25, %s5312_s23  ;;  %s5316_s29 = sshll.u32 %s5396_s16, 4  ;;  %s5317_s29 = int_to_ptr.vmem [resolvable:$false] %s5316_s29 }
 0x28a   : > { %s5318_s30 = scalar_lea.vmem %s5317_s29, 256  ;;  %p5319_p7 = scmp.lt.s32.totalorder %s6455_s25, %s5317_s29 }
 0x28b   : > { %v3164_v3 = vadd.f32 %v3163_v43, %v3162_v2  ;;  %v3232_v42 = vrot.slane %v3231_v54, 2  ;;  %p5314_p13 = pnand %p5313_p10, %p5511_p12  ;;  %p5320_p9 = scmp.lt.s32.totalorder %s5318_s30, %s5312_s23 }
 0x28d   : > { %v3165_v48 = vrot.slane %v3164_v3, 1  ;;  %v3233_v19 = vadd.f32 %v3232_v42, %v3231_v54  ;;  %p5315_p3 = pneg %p5314_p13  ;;  %p5321_p1 = por %p5320_p9, %p5319_p7 }
 0x28f   : > { %v3234_v8 = vrot.slane %v3233_v19, 1  ;;  %v3166_v24 = vadd.f32 %v3165_v48, %v3164_v3  ;;  %p5322_p0 = pnand %p5321_p1, %p5315_p3 }
 0x291   : > { %v3235_v25 = vadd.f32 %v3234_v8, %v3233_v19 }
 0x293   : > { %v3251_v34 = vsel %vm3250_vm3, %v3166_v24, %v3235_v25 }
 0x294   : > { %3252 = vst [vmem:[%s214_s4] sm:$0xff] %v3251_v34 }
 0x295   : > { %5325 = shalt.err (!%p5322_p0)
}
 0x296   : > { %s5326_s6 = scalar_lea.hbm %s6453_s27, 128  ;;  %s5330_s10 = scalar_lea.hbm %s6500_s3, 256 }
 0x297   : > { %p5327_p5 = scmp.ne.s32.totalorder %s6453_s27, %s5326_s6  ;;  %p5331_p4 = scmp.lt.u32.totalorder %s6453_s27, %s6500_s3 }
 0x298   : > { %p5332_p6 = scmp.lt.u32.totalorder %s5330_s10, %s5326_s6  ;;  %p5334_p10 = scmp.lt.u32.totalorder %s5326_s6, %s6453_s27 }
 0x299   : > { %p5328_p11 = pnand %p5327_p5, %p5511_p12 }
 0x29a   : > { %p5333_p8 = por %p5332_p6, %p5331_p4 }
 0x29b   : > { %p5329_p2 = pneg %p5328_p11 }
 0x29c   : > { %p5335_p13 = por %p5334_p10, %p5333_p8 }
 0x29e   : > { %p5336_p3 = pnand %p5335_p13, %p5329_p2 }
 0x2a0   : > { %5339 = shalt.err (!%p5336_p3)
}
 0x2a1   : > { %5140 = dma.vmem_to_hbm [thread:$0]  (%p5511_p12), %s6455_s25, 128, %s6453_s27, %s3259_s28  }
 0x2a2 PF: > { %s3300_s20 = sand.u32 1, %s5374_s12   ;;  %p6704_p7 = scmp.ne.s32.totalorder %s6592_s19, 0 }
 0x2a3   : > { %p6705_p9 = scmp.ge.s32.totalorder %s5386_s15, 2  ;;  %s3301_s9 = scalar_lea.sflag [#allocation5], %s3300_s20 }
 0x2a5   : > { %p5152_p1 = pnand %p6705_p9, %p6704_p7 }
 0x2a7   : > { %5365 = dma.done.wait (!%p5152_p1), %s3301_s9, 4096  }
 0x2a8   : > { %5367 = vsyncadd (!%p5152_p1), %s3301_s9, 4294963200  ;;  %s3310_s8 = scalar_lea.sflag [#allocation10], %s3300_s20 }
 0x2a9   : > { %5369 = dma.done.wait (!%p5152_p1), %s3310_s8, 128  }
 0x2aa   : > { %5371 = vsyncadd (!%p5152_p1), %s3310_s8, 4294967168  ;;  %p21_p12 = scmp.ge.s32.totalorder %s5473_s24, 4   ;;  %s6706_s12 = smov %s5378_s13 }
 0x2ab   : > { %s6707_s13 = smov %s5382_s14  ;;  %s6708_s14 = smov %s5507_s17 }
 0x2ac   : > { %s6709_s15 = smov %s5473_s24  ;;  %23 = sbr.rel (!%p21_p12) target bundleno = 8 (0x8), region = 103 }
 0x2b3   :  { %3315 = vsyncpa [#allocation4], 1 }
 0x2b4   :  { %3317 = vsyncpa [#allocation4 + $0x1], 1 }
 0x2b5   :  { %3318 = vsyncpa [#allocation7], 1 }
 0x2b6   :  { %3319 = vsyncpa [#allocation5], 1 }
 0x2b7   :  { %3321 = vsyncpa [#allocation5 + $0x1], 1 }
 0x2b8   :  { %3322 = vsyncpa [#allocation10], 1 }
 0x2b9   :  { %3324 = vsyncpa [#allocation10 + $0x1], 1 }

</bundles_post_ra>
